<compile_context>
chip_gen: v6e
topology: v6e:2x2x1
jax: 0.10.0
libtpu: 0.0.40
codegen_flags: <defaults>
</compile_context>

<pallas_src>
import jax
import jax.numpy as jnp
from jax.experimental import pallas as pl
from jax.experimental.pallas import tpu as pltpu

EPS = 1e-5


def _realnvp_kernel(x_ref, w_ref, v_ref, out_ref):
    x = x_ref[...].astype(jnp.float32)            # [B, D]
    B, D = x.shape
    L = w_ref.shape[0]
    H2 = w_ref.shape[2]                           # 2 * n_hidden
    H = H2 // 2

    # Hoisted lane selector: lanes [0, H) -> scale net (tanh), [H, 2H) -> translate net (relu).
    lane = jax.lax.broadcasted_iota(jnp.int32, (B, H2), 1)
    is_scale = lane < H

    sum_ld = jnp.zeros((B, 1), jnp.float32)       # per-sample sum of log|det J|

    for l in range(L):                            # static unroll (layers are sequential)
        w = w_ref[l]                              # [D + 4H, 2H] packed weight slab
        v = v_ref[l]                              # [8, 2H]     packed vector slab
        w1 = w[:D, :]                             # [D,  2H]  = [ws1 | wt1]
        w2 = w[D:D + H2, :]                       # [2H, 2H]  = blockdiag(ws2, wt2)
        w3 = w[D + H2:, :]                        # [2H, 2H]  = blockdiag(ws3, wt3), cols >= 2D are zero
        b1 = v[0:1, :]                            # [1, 2H]   = [bs1 | bt1]
        b2 = v[1:2, :]                            # [1, 2H]   = [bs2 | bt2]
        b3 = v[2:3, :]                            # [1, 2H]   = [bs3 | bt3 | 0...]
        mask = v[3:4, :D]                         # [1, D]
        gamma = v[4:5, :D]                        # [1, D]    = exp(log_gamma), host-precomputed
        lg = v[5:6, :D]                           # [1, D]    = log_gamma
        beta = v[6:7, :D]                         # [1, D]

        one_m = 1.0 - mask
        x_m = x * mask                            # [B, D]

        # ---- fused scale/translate MLP (3 block matmuls) ---------------------
        z1 = jnp.dot(x_m, w1, preferred_element_type=jnp.float32) + b1         # [B, 2H]
        h1 = jnp.where(is_scale, jnp.tanh(z1), jnp.maximum(z1, 0.0))
        z2 = jnp.dot(h1, w2, preferred_element_type=jnp.float32) + b2          # [B, 2H]
        h2 = jnp.where(is_scale, jnp.tanh(z2), jnp.maximum(z2, 0.0))
        st = jnp.dot(h2, w3, preferred_element_type=jnp.float32) + b3          # [B, 2H]
        s = st[:, :D]                             # scale output    [B, D]
        t = st[:, D:2 * D]                        # translate output [B, D]

        # ---- coupling transform ----------------------------------------------
        u = x_m + one_m * (x - t) * jnp.exp(-s)
        sum_ld = sum_ld - jnp.sum(one_m * s, axis=1, keepdims=True)

        # ---- flow batch-norm ---------------------------------------------------
        # TODO(synk): BatchNorm class source was not provided with the module; a
        # standard invertible batch-norm (batch statistics, learned log_gamma/beta)
        # is implemented here and `set_batch_stats` / running stats are ignored.
        mean = jnp.mean(u, axis=0, keepdims=True)                        # [1, D]
        diff = u - mean
        var = jnp.mean(diff * diff, axis=0, keepdims=True)               # [1, D]
        x = gamma * diff * jax.lax.rsqrt(var + EPS) + beta
        sum_ld = sum_ld + jnp.sum(lg - 0.5 * jnp.log(var + EPS))         # scalar per layer

    # Fold x and log-det into one lane-contiguous output: cols [0:D] = x, [D:2D] = ld.
    out_ref[...] = jnp.concatenate([x, jnp.broadcast_to(sum_ld, (B, D))], axis=1)


def realnvp_forward(x, packed_params):
    """x: [B, D] fp32; packed_params = (weight_slab [L, D+4H, 2H], vector_slab [L, 8, 2H])."""
    wslab, vslab = packed_params
    B, D = x.shape
    vmem = pl.BlockSpec(memory_space=pltpu.MemorySpace.VMEM)
    out = pl.pallas_call(
        _realnvp_kernel,
        out_shape=jax.ShapeDtypeStruct((B, 2 * D), jnp.float32),
        in_specs=[vmem, vmem, vmem],
        out_specs=vmem,
    )(x, wslab, vslab)
    return out[:, :D], out[:, D]


def init_params(key, data_dim, n_c_layers=4, n_hidden=32):
    """Per-matrix parameters for n_c_layers coupling+batchnorm blocks (hidden_dims=2)."""
    D, H, L = data_dim, n_hidden, n_c_layers
    keys = iter(jax.random.split(key, L * 14))

    def lin(k, fan_in, shape):
        bound = fan_in ** -0.5   # PyTorch nn.Linear default init range
        return jax.random.uniform(k, shape, jnp.float32, -bound, bound)

    names = ("mask", "ws1", "bs1", "ws2", "bs2", "ws3", "bs3",
             "wt1", "bt1", "wt2", "bt2", "wt3", "bt3", "lg", "beta")
    lists = {n: [] for n in names}
    mask = (jnp.arange(D) % 2).astype(jnp.float32)
    for _ in range(L):
        lists["mask"].append(mask.reshape(1, D))
        lists["ws1"].append(lin(next(keys), D, (D, H)))
        lists["bs1"].append(lin(next(keys), D, (1, H)))
        lists["ws2"].append(lin(next(keys), H, (H, H)))
        lists["bs2"].append(lin(next(keys), H, (1, H)))
        lists["ws3"].append(lin(next(keys), H, (H, D)))
        lists["bs3"].append(lin(next(keys), H, (1, D)))
        lists["wt1"].append(lin(next(keys), D, (D, H)))
        lists["bt1"].append(lin(next(keys), D, (1, H)))
        lists["wt2"].append(lin(next(keys), H, (H, H)))
        lists["bt2"].append(lin(next(keys), H, (1, H)))
        lists["wt3"].append(lin(next(keys), H, (H, D)))
        lists["bt3"].append(lin(next(keys), H, (1, D)))
        lists["lg"].append(0.1 * jax.random.normal(next(keys), (1, D), jnp.float32))
        lists["beta"].append(0.1 * jax.random.normal(next(keys), (1, D), jnp.float32))
        mask = 1.0 - mask
    return tuple(jnp.stack(lists[n], axis=0) for n in names)


def pack_params(params):
    """Pack per-matrix params into (weight_slab [L, D+4H, 2H], vector_slab [L, 8, 2H])."""
    (mask, ws1, bs1, ws2, bs2, ws3, bs3,
     wt1, bt1, wt2, bt2, wt3, bt3, lg, beta) = params
    L, D, H = ws1.shape
    H2 = 2 * H
    assert H >= D, "packing assumes n_hidden >= data_dim"

    def pad_row(row):
        return jnp.pad(row, ((0, 0), (0, H2 - row.shape[1])))

    w_layers, v_layers = [], []
    for l in range(L):
        w1f = jnp.concatenate([ws1[l], wt1[l]], axis=1)                       # [D, 2H]
        w2f = jnp.zeros((H2, H2), jnp.float32)
        w2f = w2f.at[:H, :H].set(ws2[l]).at[H:, H:].set(wt2[l])               # blockdiag
        w3f = jnp.zeros((H2, H2), jnp.float32)
        w3f = w3f.at[:H, :D].set(ws3[l]).at[H:, D:2 * D].set(wt3[l])          # blockdiag (cols >= 2D zero)
        w_layers.append(jnp.concatenate([w1f, w2f, w3f], axis=0))             # [D+4H, 2H]

        rows = [
            jnp.concatenate([bs1[l], bt1[l]], axis=1),                        # [1, 2H]
            jnp.concatenate([bs2[l], bt2[l]], axis=1),                        # [1, 2H]
            pad_row(jnp.concatenate([bs3[l], bt3[l]], axis=1)),               # [1, 2H]
            pad_row(mask[l]),                                                 # [1, 2H]
            pad_row(jnp.exp(lg[l])),                                          # gamma precomputed on host
            pad_row(lg[l]),
            pad_row(beta[l]),
            jnp.zeros((1, H2), jnp.float32),                                  # padding row
        ]
        v_layers.append(jnp.concatenate(rows, axis=0))                        # [8, 2H]
    return jnp.stack(w_layers, axis=0), jnp.stack(v_layers, axis=0)


def realnvp_ref(x, params):
    """Pure-JAX reference with identical semantics (for verification)."""
    (mask, ws1, bs1, ws2, bs2, ws3, bs3,
     wt1, bt1, wt2, bt2, wt3, bt3, lg, beta) = params
    L = mask.shape[0]
    sum_ld = jnp.zeros((x.shape[0],), jnp.float32)
    for l in range(L):
        m, om = mask[l], 1.0 - mask[l]
        x_m = x * m
        h = jnp.tanh(x_m @ ws1[l] + bs1[l])
        h = jnp.tanh(h @ ws2[l] + bs2[l])
        s = h @ ws3[l] + bs3[l]
        g = jax.nn.relu(x_m @ wt1[l] + bt1[l])
        g = jax.nn.relu(g @ wt2[l] + bt2[l])
        t = g @ wt3[l] + bt3[l]
        u = x_m + om * (x - t) * jnp.exp(-s)
        sum_ld = sum_ld - jnp.sum(om * s, axis=1)
        mean = u.mean(0, keepdims=True)
        var = ((u - mean) ** 2).mean(0, keepdims=True)
        x = jnp.exp(lg[l]) * (u - mean) / jnp.sqrt(var + EPS) + beta[l]
        sum_ld = sum_ld + jnp.sum(lg[l] - 0.5 * jnp.log(var + EPS))
    return x, sum_ld


if __name__ == "__main__":
    B, D, H, L = 8, 8, 32, 4   # batch, data_dim, n_hidden, n_c_layers (hidden_dims=2)
    key = jax.random.PRNGKey(0)
    kx, kp = jax.random.split(key)
    x = jax.random.normal(kx, (B, D), jnp.float32)
    params = init_params(kp, D, n_c_layers=L, n_hidden=H)
    packed = pack_params(params)

    out_x, out_ld = realnvp_forward(x, packed)
    jax.block_until_ready((out_x, out_ld))

    ref_x, ref_ld = realnvp_ref(x, params)
    assert out_x.shape == (B, D) and out_ld.shape == (B,)
    assert jnp.allclose(out_x, ref_x, rtol=1e-4, atol=1e-4)
    assert jnp.allclose(out_ld, ref_ld, rtol=1e-4, atol=1e-4)
    print("KERNEL_OK")
</pallas_src>

<mosaic_0001>
module attributes {stable_mosaic.version = 11 : i64} {
  func.func @_realnvp_kernel(%arg0: memref<8x8xf32, #tpu.memory_space<vmem>>, %arg1: memref<4x136x64xf32, #tpu.memory_space<vmem>>, %arg2: memref<4x8x64xf32, #tpu.memory_space<vmem>>, %arg3: memref<8x16xf32, #tpu.memory_space<vmem>>) attributes {dimension_semantics = [], scalar_prefetch = 0 : i64, scratch_operands = 0 : i64, tpu.core_type = #tpu.core_type<tc>} {
    %c0 = arith.constant 0 : index
    %c0_0 = arith.constant 0 : index
    %0 = vector.load %arg0[%c0, %c0_0] : memref<8x8xf32, #tpu.memory_space<vmem>>, vector<8x8xf32>
    %1 = tpu.iota {dimensions = array<i32: 1>} : vector<8x64xi32>
    %c32_i32 = arith.constant 32 : i32
    %2 = vector.broadcast %c32_i32 : i32 to vector<8x64xi32>
    %3 = arith.cmpi slt, %1, %2 : vector<8x64xi32>
    %cst = arith.constant 0.000000e+00 : f32
    %4 = vector.broadcast %cst : f32 to vector<8x1xf32>
    %c0_1 = arith.constant 0 : index
    %c0_2 = arith.constant 0 : index
    %c0_3 = arith.constant 0 : index
    %5 = vector.load %arg1[%c0_1, %c0_2, %c0_3] : memref<4x136x64xf32, #tpu.memory_space<vmem>>, vector<1x136x64xf32>
    %6 = vector.shape_cast %5 : vector<1x136x64xf32> to vector<136x64xf32>
    %c0_4 = arith.constant 0 : index
    %c0_5 = arith.constant 0 : index
    %c0_6 = arith.constant 0 : index
    %7 = vector.load %arg2[%c0_4, %c0_5, %c0_6] : memref<4x8x64xf32, #tpu.memory_space<vmem>>, vector<1x8x64xf32>
    %8 = vector.shape_cast %7 : vector<1x8x64xf32> to vector<8x64xf32>
    %9 = vector.extract_strided_slice %6 {offsets = [0, 0], sizes = [8, 64], strides = [1, 1]} : vector<136x64xf32> to vector<8x64xf32>
    %10 = vector.extract_strided_slice %6 {offsets = [8, 0], sizes = [64, 64], strides = [1, 1]} : vector<136x64xf32> to vector<64x64xf32>
    %11 = vector.extract_strided_slice %6 {offsets = [72, 0], sizes = [64, 64], strides = [1, 1]} : vector<136x64xf32> to vector<64x64xf32>
    %12 = vector.extract_strided_slice %8 {offsets = [0, 0], sizes = [1, 64], strides = [1, 1]} : vector<8x64xf32> to vector<1x64xf32>
    %13 = vector.extract_strided_slice %8 {offsets = [1, 0], sizes = [1, 64], strides = [1, 1]} : vector<8x64xf32> to vector<1x64xf32>
    %14 = vector.extract_strided_slice %8 {offsets = [2, 0], sizes = [1, 64], strides = [1, 1]} : vector<8x64xf32> to vector<1x64xf32>
    %15 = vector.extract_strided_slice %8 {offsets = [3, 0], sizes = [1, 8], strides = [1, 1]} : vector<8x64xf32> to vector<1x8xf32>
    %16 = vector.extract_strided_slice %8 {offsets = [4, 0], sizes = [1, 8], strides = [1, 1]} : vector<8x64xf32> to vector<1x8xf32>
    %17 = vector.extract_strided_slice %8 {offsets = [5, 0], sizes = [1, 8], strides = [1, 1]} : vector<8x64xf32> to vector<1x8xf32>
    %18 = vector.extract_strided_slice %8 {offsets = [6, 0], sizes = [1, 8], strides = [1, 1]} : vector<8x64xf32> to vector<1x8xf32>
    %cst_7 = arith.constant 1.000000e+00 : f32
    %19 = vector.broadcast %cst_7 : f32 to vector<1x8xf32>
    %20 = arith.subf %19, %15 : vector<1x8xf32>
    %21 = vector.broadcast %15 : vector<1x8xf32> to vector<8x8xf32>
    %22 = arith.mulf %0, %21 : vector<8x8xf32>
    %cst_8 = arith.constant dense<0.000000e+00> : vector<8x64xf32>
    %23 = tpu.matmul %22, %9, %cst_8 {dimension_numbers = #tpu.dot_dimension_numbers<[1], [0], [0], [1], [0, 0, 1, 1], [], []>} : vector<8x8xf32>, vector<8x64xf32>, vector<8x64xf32> -> vector<8x64xf32>
    %24 = vector.broadcast %12 : vector<1x64xf32> to vector<8x64xf32>
    %25 = arith.addf %23, %24 : vector<8x64xf32>
    %26 = math.tanh %25 : vector<8x64xf32>
    %cst_9 = arith.constant 0.000000e+00 : f32
    %27 = vector.broadcast %cst_9 : f32 to vector<8x64xf32>
    %28 = arith.maximumf %25, %27 : vector<8x64xf32>
    %29 = arith.select %3, %26, %28 : vector<8x64xi1>, vector<8x64xf32>
    %cst_10 = arith.constant dense<0.000000e+00> : vector<8x64xf32>
    %30 = tpu.matmul %29, %10, %cst_10 {dimension_numbers = #tpu.dot_dimension_numbers<[1], [0], [0], [1], [0, 0, 1, 1], [], []>} : vector<8x64xf32>, vector<64x64xf32>, vector<8x64xf32> -> vector<8x64xf32>
    %31 = vector.broadcast %13 : vector<1x64xf32> to vector<8x64xf32>
    %32 = arith.addf %30, %31 : vector<8x64xf32>
    %33 = math.tanh %32 : vector<8x64xf32>
    %cst_11 = arith.constant 0.000000e+00 : f32
    %34 = vector.broadcast %cst_11 : f32 to vector<8x64xf32>
    %35 = arith.maximumf %32, %34 : vector<8x64xf32>
    %36 = arith.select %3, %33, %35 : vector<8x64xi1>, vector<8x64xf32>
    %cst_12 = arith.constant dense<0.000000e+00> : vector<8x64xf32>
    %37 = tpu.matmul %36, %11, %cst_12 {dimension_numbers = #tpu.dot_dimension_numbers<[1], [0], [0], [1], [0, 0, 1, 1], [], []>} : vector<8x64xf32>, vector<64x64xf32>, vector<8x64xf32> -> vector<8x64xf32>
    %38 = vector.broadcast %14 : vector<1x64xf32> to vector<8x64xf32>
    %39 = arith.addf %37, %38 : vector<8x64xf32>
    %40 = vector.extract_strided_slice %39 {offsets = [0, 0], sizes = [8, 8], strides = [1, 1]} : vector<8x64xf32> to vector<8x8xf32>
    %41 = vector.extract_strided_slice %39 {offsets = [0, 8], sizes = [8, 8], strides = [1, 1]} : vector<8x64xf32> to vector<8x8xf32>
    %42 = arith.subf %0, %41 : vector<8x8xf32>
    %43 = vector.broadcast %20 : vector<1x8xf32> to vector<8x8xf32>
    %44 = arith.mulf %43, %42 : vector<8x8xf32>
    %cst_13 = arith.constant 0.000000e+00 : f32
    %45 = vector.broadcast %cst_13 : f32 to vector<8x8xf32>
    %46 = arith.subf %45, %40 : vector<8x8xf32>
    %47 = math.exp %46 : vector<8x8xf32>
    %48 = arith.mulf %44, %47 : vector<8x8xf32>
    %49 = arith.addf %22, %48 : vector<8x8xf32>
    %50 = vector.broadcast %20 : vector<1x8xf32> to vector<8x8xf32>
    %51 = arith.mulf %50, %40 : vector<8x8xf32>
    %cst_14 = arith.constant dense<0.000000e+00> : vector<8xf32>
    %52 = vector.multi_reduction <add>, %51, %cst_14 [1] : vector<8x8xf32> to vector<8xf32>
    %53 = vector.shape_cast %52 : vector<8xf32> to vector<8x1xf32>
    %54 = arith.subf %4, %53 : vector<8x1xf32>
    %cst_15 = arith.constant dense<0.000000e+00> : vector<8xf32>
    %55 = vector.multi_reduction <add>, %49, %cst_15 [0] : vector<8x8xf32> to vector<8xf32>
    %56 = vector.shape_cast %55 : vector<8xf32> to vector<1x8xf32>
    %cst_16 = arith.constant 8.000000e+00 : f32
    %57 = vector.broadcast %cst_16 : f32 to vector<1x8xf32>
    %58 = arith.divf %56, %57 : vector<1x8xf32>
    %59 = vector.broadcast %58 : vector<1x8xf32> to vector<8x8xf32>
    %60 = arith.subf %49, %59 : vector<8x8xf32>
    %61 = arith.mulf %60, %60 : vector<8x8xf32>
    %cst_17 = arith.constant dense<0.000000e+00> : vector<8xf32>
    %62 = vector.multi_reduction <add>, %61, %cst_17 [0] : vector<8x8xf32> to vector<8xf32>
    %63 = vector.shape_cast %62 : vector<8xf32> to vector<1x8xf32>
    %cst_18 = arith.constant 8.000000e+00 : f32
    %64 = vector.broadcast %cst_18 : f32 to vector<1x8xf32>
    %65 = arith.divf %63, %64 : vector<1x8xf32>
    %66 = vector.broadcast %16 : vector<1x8xf32> to vector<8x8xf32>
    %67 = arith.mulf %66, %60 : vector<8x8xf32>
    %cst_19 = arith.constant 9.99999974E-6 : f32
    %68 = vector.broadcast %cst_19 : f32 to vector<1x8xf32>
    %69 = arith.addf %65, %68 : vector<1x8xf32>
    %70 = math.rsqrt %69 : vector<1x8xf32>
    %71 = vector.broadcast %70 : vector<1x8xf32> to vector<8x8xf32>
    %72 = arith.mulf %67, %71 : vector<8x8xf32>
    %73 = vector.broadcast %18 : vector<1x8xf32> to vector<8x8xf32>
    %74 = arith.addf %72, %73 : vector<8x8xf32>
    %cst_20 = arith.constant 9.99999974E-6 : f32
    %75 = vector.broadcast %cst_20 : f32 to vector<1x8xf32>
    %76 = arith.addf %65, %75 : vector<1x8xf32>
    %77 = math.log %76 : vector<1x8xf32>
    %cst_21 = arith.constant 5.000000e-01 : f32
    %78 = vector.broadcast %cst_21 : f32 to vector<1x8xf32>
    %79 = arith.mulf %78, %77 : vector<1x8xf32>
    %80 = arith.subf %17, %79 : vector<1x8xf32>
    %81 = vector.shape_cast %80 : vector<1x8xf32> to vector<1x1x8xf32>
    %cst_22 = arith.constant dense<0.000000e+00> : vector<1xf32>
    %82 = vector.multi_reduction <add>, %81, %cst_22 [1, 2] : vector<1x1x8xf32> to vector<1xf32>
    %83 = vector.shape_cast %82 : vector<1xf32> to vector<1x1x1xf32>
    %84 = vector.extract %83[0, 0, 0] : f32 from vector<1x1x1xf32>
    %85 = vector.broadcast %84 : f32 to vector<8x1xf32>
    %86 = arith.addf %54, %85 : vector<8x1xf32>
    %c1 = arith.constant 1 : index
    %c0_23 = arith.constant 0 : index
    %c0_24 = arith.constant 0 : index
    %87 = vector.load %arg1[%c1, %c0_23, %c0_24] : memref<4x136x64xf32, #tpu.memory_space<vmem>>, vector<1x136x64xf32>
    %88 = vector.shape_cast %87 : vector<1x136x64xf32> to vector<136x64xf32>
    %c1_25 = arith.constant 1 : index
    %c0_26 = arith.constant 0 : index
    %c0_27 = arith.constant 0 : index
    %89 = vector.load %arg2[%c1_25, %c0_26, %c0_27] : memref<4x8x64xf32, #tpu.memory_space<vmem>>, vector<1x8x64xf32>
    %90 = vector.shape_cast %89 : vector<1x8x64xf32> to vector<8x64xf32>
    %91 = vector.extract_strided_slice %88 {offsets = [0, 0], sizes = [8, 64], strides = [1, 1]} : vector<136x64xf32> to vector<8x64xf32>
    %92 = vector.extract_strided_slice %88 {offsets = [8, 0], sizes = [64, 64], strides = [1, 1]} : vector<136x64xf32> to vector<64x64xf32>
    %93 = vector.extract_strided_slice %88 {offsets = [72, 0], sizes = [64, 64], strides = [1, 1]} : vector<136x64xf32> to vector<64x64xf32>
    %94 = vector.extract_strided_slice %90 {offsets = [0, 0], sizes = [1, 64], strides = [1, 1]} : vector<8x64xf32> to vector<1x64xf32>
    %95 = vector.extract_strided_slice %90 {offsets = [1, 0], sizes = [1, 64], strides = [1, 1]} : vector<8x64xf32> to vector<1x64xf32>
    %96 = vector.extract_strided_slice %90 {offsets = [2, 0], sizes = [1, 64], strides = [1, 1]} : vector<8x64xf32> to vector<1x64xf32>
    %97 = vector.extract_strided_slice %90 {offsets = [3, 0], sizes = [1, 8], strides = [1, 1]} : vector<8x64xf32> to vector<1x8xf32>
    %98 = vector.extract_strided_slice %90 {offsets = [4, 0], sizes = [1, 8], strides = [1, 1]} : vector<8x64xf32> to vector<1x8xf32>
    %99 = vector.extract_strided_slice %90 {offsets = [5, 0], sizes = [1, 8], strides = [1, 1]} : vector<8x64xf32> to vector<1x8xf32>
    %100 = vector.extract_strided_slice %90 {offsets = [6, 0], sizes = [1, 8], strides = [1, 1]} : vector<8x64xf32> to vector<1x8xf32>
    %cst_28 = arith.constant 1.000000e+00 : f32
    %101 = vector.broadcast %cst_28 : f32 to vector<1x8xf32>
    %102 = arith.subf %101, %97 : vector<1x8xf32>
    %103 = vector.broadcast %97 : vector<1x8xf32> to vector<8x8xf32>
    %104 = arith.mulf %74, %103 : vector<8x8xf32>
    %cst_29 = arith.constant dense<0.000000e+00> : vector<8x64xf32>
    %105 = tpu.matmul %104, %91, %cst_29 {dimension_numbers = #tpu.dot_dimension_numbers<[1], [0], [0], [1], [0, 0, 1, 1], [], []>} : vector<8x8xf32>, vector<8x64xf32>, vector<8x64xf32> -> vector<8x64xf32>
    %106 = vector.broadcast %94 : vector<1x64xf32> to vector<8x64xf32>
    %107 = arith.addf %105, %106 : vector<8x64xf32>
    %108 = math.tanh %107 : vector<8x64xf32>
    %cst_30 = arith.constant 0.000000e+00 : f32
    %109 = vector.broadcast %cst_30 : f32 to vector<8x64xf32>
    %110 = arith.maximumf %107, %109 : vector<8x64xf32>
    %111 = arith.select %3, %108, %110 : vector<8x64xi1>, vector<8x64xf32>
    %cst_31 = arith.constant dense<0.000000e+00> : vector<8x64xf32>
    %112 = tpu.matmul %111, %92, %cst_31 {dimension_numbers = #tpu.dot_dimension_numbers<[1], [0], [0], [1], [0, 0, 1, 1], [], []>} : vector<8x64xf32>, vector<64x64xf32>, vector<8x64xf32> -> vector<8x64xf32>
    %113 = vector.broadcast %95 : vector<1x64xf32> to vector<8x64xf32>
    %114 = arith.addf %112, %113 : vector<8x64xf32>
    %115 = math.tanh %114 : vector<8x64xf32>
    %cst_32 = arith.constant 0.000000e+00 : f32
    %116 = vector.broadcast %cst_32 : f32 to vector<8x64xf32>
    %117 = arith.maximumf %114, %116 : vector<8x64xf32>
    %118 = arith.select %3, %115, %117 : vector<8x64xi1>, vector<8x64xf32>
    %cst_33 = arith.constant dense<0.000000e+00> : vector<8x64xf32>
    %119 = tpu.matmul %118, %93, %cst_33 {dimension_numbers = #tpu.dot_dimension_numbers<[1], [0], [0], [1], [0, 0, 1, 1], [], []>} : vector<8x64xf32>, vector<64x64xf32>, vector<8x64xf32> -> vector<8x64xf32>
    %120 = vector.broadcast %96 : vector<1x64xf32> to vector<8x64xf32>
    %121 = arith.addf %119, %120 : vector<8x64xf32>
    %122 = vector.extract_strided_slice %121 {offsets = [0, 0], sizes = [8, 8], strides = [1, 1]} : vector<8x64xf32> to vector<8x8xf32>
    %123 = vector.extract_strided_slice %121 {offsets = [0, 8], sizes = [8, 8], strides = [1, 1]} : vector<8x64xf32> to vector<8x8xf32>
    %124 = arith.subf %74, %123 : vector<8x8xf32>
    %125 = vector.broadcast %102 : vector<1x8xf32> to vector<8x8xf32>
    %126 = arith.mulf %125, %124 : vector<8x8xf32>
    %cst_34 = arith.constant 0.000000e+00 : f32
    %127 = vector.broadcast %cst_34 : f32 to vector<8x8xf32>
    %128 = arith.subf %127, %122 : vector<8x8xf32>
    %129 = math.exp %128 : vector<8x8xf32>
    %130 = arith.mulf %126, %129 : vector<8x8xf32>
    %131 = arith.addf %104, %130 : vector<8x8xf32>
    %132 = vector.broadcast %102 : vector<1x8xf32> to vector<8x8xf32>
    %133 = arith.mulf %132, %122 : vector<8x8xf32>
    %cst_35 = arith.constant dense<0.000000e+00> : vector<8xf32>
    %134 = vector.multi_reduction <add>, %133, %cst_35 [1] : vector<8x8xf32> to vector<8xf32>
    %135 = vector.shape_cast %134 : vector<8xf32> to vector<8x1xf32>
    %136 = arith.subf %86, %135 : vector<8x1xf32>
    %cst_36 = arith.constant dense<0.000000e+00> : vector<8xf32>
    %137 = vector.multi_reduction <add>, %131, %cst_36 [0] : vector<8x8xf32> to vector<8xf32>
    %138 = vector.shape_cast %137 : vector<8xf32> to vector<1x8xf32>
    %cst_37 = arith.constant 8.000000e+00 : f32
    %139 = vector.broadcast %cst_37 : f32 to vector<1x8xf32>
    %140 = arith.divf %138, %139 : vector<1x8xf32>
    %141 = vector.broadcast %140 : vector<1x8xf32> to vector<8x8xf32>
    %142 = arith.subf %131, %141 : vector<8x8xf32>
    %143 = arith.mulf %142, %142 : vector<8x8xf32>
    %cst_38 = arith.constant dense<0.000000e+00> : vector<8xf32>
    %144 = vector.multi_reduction <add>, %143, %cst_38 [0] : vector<8x8xf32> to vector<8xf32>
    %145 = vector.shape_cast %144 : vector<8xf32> to vector<1x8xf32>
    %cst_39 = arith.constant 8.000000e+00 : f32
    %146 = vector.broadcast %cst_39 : f32 to vector<1x8xf32>
    %147 = arith.divf %145, %146 : vector<1x8xf32>
    %148 = vector.broadcast %98 : vector<1x8xf32> to vector<8x8xf32>
    %149 = arith.mulf %148, %142 : vector<8x8xf32>
    %cst_40 = arith.constant 9.99999974E-6 : f32
    %150 = vector.broadcast %cst_40 : f32 to vector<1x8xf32>
    %151 = arith.addf %147, %150 : vector<1x8xf32>
    %152 = math.rsqrt %151 : vector<1x8xf32>
    %153 = vector.broadcast %152 : vector<1x8xf32> to vector<8x8xf32>
    %154 = arith.mulf %149, %153 : vector<8x8xf32>
    %155 = vector.broadcast %100 : vector<1x8xf32> to vector<8x8xf32>
    %156 = arith.addf %154, %155 : vector<8x8xf32>
    %cst_41 = arith.constant 9.99999974E-6 : f32
    %157 = vector.broadcast %cst_41 : f32 to vector<1x8xf32>
    %158 = arith.addf %147, %157 : vector<1x8xf32>
    %159 = math.log %158 : vector<1x8xf32>
    %cst_42 = arith.constant 5.000000e-01 : f32
    %160 = vector.broadcast %cst_42 : f32 to vector<1x8xf32>
    %161 = arith.mulf %160, %159 : vector<1x8xf32>
    %162 = arith.subf %99, %161 : vector<1x8xf32>
    %163 = vector.shape_cast %162 : vector<1x8xf32> to vector<1x1x8xf32>
    %cst_43 = arith.constant dense<0.000000e+00> : vector<1xf32>
    %164 = vector.multi_reduction <add>, %163, %cst_43 [1, 2] : vector<1x1x8xf32> to vector<1xf32>
    %165 = vector.shape_cast %164 : vector<1xf32> to vector<1x1x1xf32>
    %166 = vector.extract %165[0, 0, 0] : f32 from vector<1x1x1xf32>
    %167 = vector.broadcast %166 : f32 to vector<8x1xf32>
    %168 = arith.addf %136, %167 : vector<8x1xf32>
    %c2 = arith.constant 2 : index
    %c0_44 = arith.constant 0 : index
    %c0_45 = arith.constant 0 : index
    %169 = vector.load %arg1[%c2, %c0_44, %c0_45] : memref<4x136x64xf32, #tpu.memory_space<vmem>>, vector<1x136x64xf32>
    %170 = vector.shape_cast %169 : vector<1x136x64xf32> to vector<136x64xf32>
    %c2_46 = arith.constant 2 : index
    %c0_47 = arith.constant 0 : index
    %c0_48 = arith.constant 0 : index
    %171 = vector.load %arg2[%c2_46, %c0_47, %c0_48] : memref<4x8x64xf32, #tpu.memory_space<vmem>>, vector<1x8x64xf32>
    %172 = vector.shape_cast %171 : vector<1x8x64xf32> to vector<8x64xf32>
    %173 = vector.extract_strided_slice %170 {offsets = [0, 0], sizes = [8, 64], strides = [1, 1]} : vector<136x64xf32> to vector<8x64xf32>
    %174 = vector.extract_strided_slice %170 {offsets = [8, 0], sizes = [64, 64], strides = [1, 1]} : vector<136x64xf32> to vector<64x64xf32>
    %175 = vector.extract_strided_slice %170 {offsets = [72, 0], sizes = [64, 64], strides = [1, 1]} : vector<136x64xf32> to vector<64x64xf32>
    %176 = vector.extract_strided_slice %172 {offsets = [0, 0], sizes = [1, 64], strides = [1, 1]} : vector<8x64xf32> to vector<1x64xf32>
    %177 = vector.extract_strided_slice %172 {offsets = [1, 0], sizes = [1, 64], strides = [1, 1]} : vector<8x64xf32> to vector<1x64xf32>
    %178 = vector.extract_strided_slice %172 {offsets = [2, 0], sizes = [1, 64], strides = [1, 1]} : vector<8x64xf32> to vector<1x64xf32>
    %179 = vector.extract_strided_slice %172 {offsets = [3, 0], sizes = [1, 8], strides = [1, 1]} : vector<8x64xf32> to vector<1x8xf32>
    %180 = vector.extract_strided_slice %172 {offsets = [4, 0], sizes = [1, 8], strides = [1, 1]} : vector<8x64xf32> to vector<1x8xf32>
    %181 = vector.extract_strided_slice %172 {offsets = [5, 0], sizes = [1, 8], strides = [1, 1]} : vector<8x64xf32> to vector<1x8xf32>
    %182 = vector.extract_strided_slice %172 {offsets = [6, 0], sizes = [1, 8], strides = [1, 1]} : vector<8x64xf32> to vector<1x8xf32>
    %cst_49 = arith.constant 1.000000e+00 : f32
    %183 = vector.broadcast %cst_49 : f32 to vector<1x8xf32>
    %184 = arith.subf %183, %179 : vector<1x8xf32>
    %185 = vector.broadcast %179 : vector<1x8xf32> to vector<8x8xf32>
    %186 = arith.mulf %156, %185 : vector<8x8xf32>
    %cst_50 = arith.constant dense<0.000000e+00> : vector<8x64xf32>
    %187 = tpu.matmul %186, %173, %cst_50 {dimension_numbers = #tpu.dot_dimension_numbers<[1], [0], [0], [1], [0, 0, 1, 1], [], []>} : vector<8x8xf32>, vector<8x64xf32>, vector<8x64xf32> -> vector<8x64xf32>
    %188 = vector.broadcast %176 : vector<1x64xf32> to vector<8x64xf32>
    %189 = arith.addf %187, %188 : vector<8x64xf32>
    %190 = math.tanh %189 : vector<8x64xf32>
    %cst_51 = arith.constant 0.000000e+00 : f32
    %191 = vector.broadcast %cst_51 : f32 to vector<8x64xf32>
    %192 = arith.maximumf %189, %191 : vector<8x64xf32>
    %193 = arith.select %3, %190, %192 : vector<8x64xi1>, vector<8x64xf32>
    %cst_52 = arith.constant dense<0.000000e+00> : vector<8x64xf32>
    %194 = tpu.matmul %193, %174, %cst_52 {dimension_numbers = #tpu.dot_dimension_numbers<[1], [0], [0], [1], [0, 0, 1, 1], [], []>} : vector<8x64xf32>, vector<64x64xf32>, vector<8x64xf32> -> vector<8x64xf32>
    %195 = vector.broadcast %177 : vector<1x64xf32> to vector<8x64xf32>
    %196 = arith.addf %194, %195 : vector<8x64xf32>
    %197 = math.tanh %196 : vector<8x64xf32>
    %cst_53 = arith.constant 0.000000e+00 : f32
    %198 = vector.broadcast %cst_53 : f32 to vector<8x64xf32>
    %199 = arith.maximumf %196, %198 : vector<8x64xf32>
    %200 = arith.select %3, %197, %199 : vector<8x64xi1>, vector<8x64xf32>
    %cst_54 = arith.constant dense<0.000000e+00> : vector<8x64xf32>
    %201 = tpu.matmul %200, %175, %cst_54 {dimension_numbers = #tpu.dot_dimension_numbers<[1], [0], [0], [1], [0, 0, 1, 1], [], []>} : vector<8x64xf32>, vector<64x64xf32>, vector<8x64xf32> -> vector<8x64xf32>
    %202 = vector.broadcast %178 : vector<1x64xf32> to vector<8x64xf32>
    %203 = arith.addf %201, %202 : vector<8x64xf32>
    %204 = vector.extract_strided_slice %203 {offsets = [0, 0], sizes = [8, 8], strides = [1, 1]} : vector<8x64xf32> to vector<8x8xf32>
    %205 = vector.extract_strided_slice %203 {offsets = [0, 8], sizes = [8, 8], strides = [1, 1]} : vector<8x64xf32> to vector<8x8xf32>
    %206 = arith.subf %156, %205 : vector<8x8xf32>
    %207 = vector.broadcast %184 : vector<1x8xf32> to vector<8x8xf32>
    %208 = arith.mulf %207, %206 : vector<8x8xf32>
    %cst_55 = arith.constant 0.000000e+00 : f32
    %209 = vector.broadcast %cst_55 : f32 to vector<8x8xf32>
    %210 = arith.subf %209, %204 : vector<8x8xf32>
    %211 = math.exp %210 : vector<8x8xf32>
    %212 = arith.mulf %208, %211 : vector<8x8xf32>
    %213 = arith.addf %186, %212 : vector<8x8xf32>
    %214 = vector.broadcast %184 : vector<1x8xf32> to vector<8x8xf32>
    %215 = arith.mulf %214, %204 : vector<8x8xf32>
    %cst_56 = arith.constant dense<0.000000e+00> : vector<8xf32>
    %216 = vector.multi_reduction <add>, %215, %cst_56 [1] : vector<8x8xf32> to vector<8xf32>
    %217 = vector.shape_cast %216 : vector<8xf32> to vector<8x1xf32>
    %218 = arith.subf %168, %217 : vector<8x1xf32>
    %cst_57 = arith.constant dense<0.000000e+00> : vector<8xf32>
    %219 = vector.multi_reduction <add>, %213, %cst_57 [0] : vector<8x8xf32> to vector<8xf32>
    %220 = vector.shape_cast %219 : vector<8xf32> to vector<1x8xf32>
    %cst_58 = arith.constant 8.000000e+00 : f32
    %221 = vector.broadcast %cst_58 : f32 to vector<1x8xf32>
    %222 = arith.divf %220, %221 : vector<1x8xf32>
    %223 = vector.broadcast %222 : vector<1x8xf32> to vector<8x8xf32>
    %224 = arith.subf %213, %223 : vector<8x8xf32>
    %225 = arith.mulf %224, %224 : vector<8x8xf32>
    %cst_59 = arith.constant dense<0.000000e+00> : vector<8xf32>
    %226 = vector.multi_reduction <add>, %225, %cst_59 [0] : vector<8x8xf32> to vector<8xf32>
    %227 = vector.shape_cast %226 : vector<8xf32> to vector<1x8xf32>
    %cst_60 = arith.constant 8.000000e+00 : f32
    %228 = vector.broadcast %cst_60 : f32 to vector<1x8xf32>
    %229 = arith.divf %227, %228 : vector<1x8xf32>
    %230 = vector.broadcast %180 : vector<1x8xf32> to vector<8x8xf32>
    %231 = arith.mulf %230, %224 : vector<8x8xf32>
    %cst_61 = arith.constant 9.99999974E-6 : f32
    %232 = vector.broadcast %cst_61 : f32 to vector<1x8xf32>
    %233 = arith.addf %229, %232 : vector<1x8xf32>
    %234 = math.rsqrt %233 : vector<1x8xf32>
    %235 = vector.broadcast %234 : vector<1x8xf32> to vector<8x8xf32>
    %236 = arith.mulf %231, %235 : vector<8x8xf32>
    %237 = vector.broadcast %182 : vector<1x8xf32> to vector<8x8xf32>
    %238 = arith.addf %236, %237 : vector<8x8xf32>
    %cst_62 = arith.constant 9.99999974E-6 : f32
    %239 = vector.broadcast %cst_62 : f32 to vector<1x8xf32>
    %240 = arith.addf %229, %239 : vector<1x8xf32>
    %241 = math.log %240 : vector<1x8xf32>
    %cst_63 = arith.constant 5.000000e-01 : f32
    %242 = vector.broadcast %cst_63 : f32 to vector<1x8xf32>
    %243 = arith.mulf %242, %241 : vector<1x8xf32>
    %244 = arith.subf %181, %243 : vector<1x8xf32>
    %245 = vector.shape_cast %244 : vector<1x8xf32> to vector<1x1x8xf32>
    %cst_64 = arith.constant dense<0.000000e+00> : vector<1xf32>
    %246 = vector.multi_reduction <add>, %245, %cst_64 [1, 2] : vector<1x1x8xf32> to vector<1xf32>
    %247 = vector.shape_cast %246 : vector<1xf32> to vector<1x1x1xf32>
    %248 = vector.extract %247[0, 0, 0] : f32 from vector<1x1x1xf32>
    %249 = vector.broadcast %248 : f32 to vector<8x1xf32>
    %250 = arith.addf %218, %249 : vector<8x1xf32>
    %c3 = arith.constant 3 : index
    %c0_65 = arith.constant 0 : index
    %c0_66 = arith.constant 0 : index
    %251 = vector.load %arg1[%c3, %c0_65, %c0_66] : memref<4x136x64xf32, #tpu.memory_space<vmem>>, vector<1x136x64xf32>
    %252 = vector.shape_cast %251 : vector<1x136x64xf32> to vector<136x64xf32>
    %c3_67 = arith.constant 3 : index
    %c0_68 = arith.constant 0 : index
    %c0_69 = arith.constant 0 : index
    %253 = vector.load %arg2[%c3_67, %c0_68, %c0_69] : memref<4x8x64xf32, #tpu.memory_space<vmem>>, vector<1x8x64xf32>
    %254 = vector.shape_cast %253 : vector<1x8x64xf32> to vector<8x64xf32>
    %255 = vector.extract_strided_slice %252 {offsets = [0, 0], sizes = [8, 64], strides = [1, 1]} : vector<136x64xf32> to vector<8x64xf32>
    %256 = vector.extract_strided_slice %252 {offsets = [8, 0], sizes = [64, 64], strides = [1, 1]} : vector<136x64xf32> to vector<64x64xf32>
    %257 = vector.extract_strided_slice %252 {offsets = [72, 0], sizes = [64, 64], strides = [1, 1]} : vector<136x64xf32> to vector<64x64xf32>
    %258 = vector.extract_strided_slice %254 {offsets = [0, 0], sizes = [1, 64], strides = [1, 1]} : vector<8x64xf32> to vector<1x64xf32>
    %259 = vector.extract_strided_slice %254 {offsets = [1, 0], sizes = [1, 64], strides = [1, 1]} : vector<8x64xf32> to vector<1x64xf32>
    %260 = vector.extract_strided_slice %254 {offsets = [2, 0], sizes = [1, 64], strides = [1, 1]} : vector<8x64xf32> to vector<1x64xf32>
    %261 = vector.extract_strided_slice %254 {offsets = [3, 0], sizes = [1, 8], strides = [1, 1]} : vector<8x64xf32> to vector<1x8xf32>
    %262 = vector.extract_strided_slice %254 {offsets = [4, 0], sizes = [1, 8], strides = [1, 1]} : vector<8x64xf32> to vector<1x8xf32>
    %263 = vector.extract_strided_slice %254 {offsets = [5, 0], sizes = [1, 8], strides = [1, 1]} : vector<8x64xf32> to vector<1x8xf32>
    %264 = vector.extract_strided_slice %254 {offsets = [6, 0], sizes = [1, 8], strides = [1, 1]} : vector<8x64xf32> to vector<1x8xf32>
    %cst_70 = arith.constant 1.000000e+00 : f32
    %265 = vector.broadcast %cst_70 : f32 to vector<1x8xf32>
    %266 = arith.subf %265, %261 : vector<1x8xf32>
    %267 = vector.broadcast %261 : vector<1x8xf32> to vector<8x8xf32>
    %268 = arith.mulf %238, %267 : vector<8x8xf32>
    %cst_71 = arith.constant dense<0.000000e+00> : vector<8x64xf32>
    %269 = tpu.matmul %268, %255, %cst_71 {dimension_numbers = #tpu.dot_dimension_numbers<[1], [0], [0], [1], [0, 0, 1, 1], [], []>} : vector<8x8xf32>, vector<8x64xf32>, vector<8x64xf32> -> vector<8x64xf32>
    %270 = vector.broadcast %258 : vector<1x64xf32> to vector<8x64xf32>
    %271 = arith.addf %269, %270 : vector<8x64xf32>
    %272 = math.tanh %271 : vector<8x64xf32>
    %cst_72 = arith.constant 0.000000e+00 : f32
    %273 = vector.broadcast %cst_72 : f32 to vector<8x64xf32>
    %274 = arith.maximumf %271, %273 : vector<8x64xf32>
    %275 = arith.select %3, %272, %274 : vector<8x64xi1>, vector<8x64xf32>
    %cst_73 = arith.constant dense<0.000000e+00> : vector<8x64xf32>
    %276 = tpu.matmul %275, %256, %cst_73 {dimension_numbers = #tpu.dot_dimension_numbers<[1], [0], [0], [1], [0, 0, 1, 1], [], []>} : vector<8x64xf32>, vector<64x64xf32>, vector<8x64xf32> -> vector<8x64xf32>
    %277 = vector.broadcast %259 : vector<1x64xf32> to vector<8x64xf32>
    %278 = arith.addf %276, %277 : vector<8x64xf32>
    %279 = math.tanh %278 : vector<8x64xf32>
    %cst_74 = arith.constant 0.000000e+00 : f32
    %280 = vector.broadcast %cst_74 : f32 to vector<8x64xf32>
    %281 = arith.maximumf %278, %280 : vector<8x64xf32>
    %282 = arith.select %3, %279, %281 : vector<8x64xi1>, vector<8x64xf32>
    %cst_75 = arith.constant dense<0.000000e+00> : vector<8x64xf32>
    %283 = tpu.matmul %282, %257, %cst_75 {dimension_numbers = #tpu.dot_dimension_numbers<[1], [0], [0], [1], [0, 0, 1, 1], [], []>} : vector<8x64xf32>, vector<64x64xf32>, vector<8x64xf32> -> vector<8x64xf32>
    %284 = vector.broadcast %260 : vector<1x64xf32> to vector<8x64xf32>
    %285 = arith.addf %283, %284 : vector<8x64xf32>
    %286 = vector.extract_strided_slice %285 {offsets = [0, 0], sizes = [8, 8], strides = [1, 1]} : vector<8x64xf32> to vector<8x8xf32>
    %287 = vector.extract_strided_slice %285 {offsets = [0, 8], sizes = [8, 8], strides = [1, 1]} : vector<8x64xf32> to vector<8x8xf32>
    %288 = arith.subf %238, %287 : vector<8x8xf32>
    %289 = vector.broadcast %266 : vector<1x8xf32> to vector<8x8xf32>
    %290 = arith.mulf %289, %288 : vector<8x8xf32>
    %cst_76 = arith.constant 0.000000e+00 : f32
    %291 = vector.broadcast %cst_76 : f32 to vector<8x8xf32>
    %292 = arith.subf %291, %286 : vector<8x8xf32>
    %293 = math.exp %292 : vector<8x8xf32>
    %294 = arith.mulf %290, %293 : vector<8x8xf32>
    %295 = arith.addf %268, %294 : vector<8x8xf32>
    %296 = vector.broadcast %266 : vector<1x8xf32> to vector<8x8xf32>
    %297 = arith.mulf %296, %286 : vector<8x8xf32>
    %cst_77 = arith.constant dense<0.000000e+00> : vector<8xf32>
    %298 = vector.multi_reduction <add>, %297, %cst_77 [1] : vector<8x8xf32> to vector<8xf32>
    %299 = vector.shape_cast %298 : vector<8xf32> to vector<8x1xf32>
    %300 = arith.subf %250, %299 : vector<8x1xf32>
    %cst_78 = arith.constant dense<0.000000e+00> : vector<8xf32>
    %301 = vector.multi_reduction <add>, %295, %cst_78 [0] : vector<8x8xf32> to vector<8xf32>
    %302 = vector.shape_cast %301 : vector<8xf32> to vector<1x8xf32>
    %cst_79 = arith.constant 8.000000e+00 : f32
    %303 = vector.broadcast %cst_79 : f32 to vector<1x8xf32>
    %304 = arith.divf %302, %303 : vector<1x8xf32>
    %305 = vector.broadcast %304 : vector<1x8xf32> to vector<8x8xf32>
    %306 = arith.subf %295, %305 : vector<8x8xf32>
    %307 = arith.mulf %306, %306 : vector<8x8xf32>
    %cst_80 = arith.constant dense<0.000000e+00> : vector<8xf32>
    %308 = vector.multi_reduction <add>, %307, %cst_80 [0] : vector<8x8xf32> to vector<8xf32>
    %309 = vector.shape_cast %308 : vector<8xf32> to vector<1x8xf32>
    %cst_81 = arith.constant 8.000000e+00 : f32
    %310 = vector.broadcast %cst_81 : f32 to vector<1x8xf32>
    %311 = arith.divf %309, %310 : vector<1x8xf32>
    %312 = vector.broadcast %262 : vector<1x8xf32> to vector<8x8xf32>
    %313 = arith.mulf %312, %306 : vector<8x8xf32>
    %cst_82 = arith.constant 9.99999974E-6 : f32
    %314 = vector.broadcast %cst_82 : f32 to vector<1x8xf32>
    %315 = arith.addf %311, %314 : vector<1x8xf32>
    %316 = math.rsqrt %315 : vector<1x8xf32>
    %317 = vector.broadcast %316 : vector<1x8xf32> to vector<8x8xf32>
    %318 = arith.mulf %313, %317 : vector<8x8xf32>
    %319 = vector.broadcast %264 : vector<1x8xf32> to vector<8x8xf32>
    %320 = arith.addf %318, %319 : vector<8x8xf32>
    %cst_83 = arith.constant 9.99999974E-6 : f32
    %321 = vector.broadcast %cst_83 : f32 to vector<1x8xf32>
    %322 = arith.addf %311, %321 : vector<1x8xf32>
    %323 = math.log %322 : vector<1x8xf32>
    %cst_84 = arith.constant 5.000000e-01 : f32
    %324 = vector.broadcast %cst_84 : f32 to vector<1x8xf32>
    %325 = arith.mulf %324, %323 : vector<1x8xf32>
    %326 = arith.subf %263, %325 : vector<1x8xf32>
    %327 = vector.shape_cast %326 : vector<1x8xf32> to vector<1x1x8xf32>
    %cst_85 = arith.constant dense<0.000000e+00> : vector<1xf32>
    %328 = vector.multi_reduction <add>, %327, %cst_85 [1, 2] : vector<1x1x8xf32> to vector<1xf32>
    %329 = vector.shape_cast %328 : vector<1xf32> to vector<1x1x1xf32>
    %330 = vector.extract %329[0, 0, 0] : f32 from vector<1x1x1xf32>
    %331 = vector.broadcast %330 : f32 to vector<8x1xf32>
    %332 = arith.addf %300, %331 : vector<8x1xf32>
    %333 = vector.shape_cast %332 : vector<8x1xf32> to vector<8x1xf32>
    %334 = vector.broadcast %333 : vector<8x1xf32> to vector<8x8xf32>
    %335 = tpu.concatenate %320, %334 in 1 : vector<8x8xf32>, vector<8x8xf32> -> vector<8x16xf32>
    %c0_86 = arith.constant 0 : index
    %c0_87 = arith.constant 0 : index
    %336 = vector.load %arg3[%c0_86, %c0_87] : memref<8x16xf32, #tpu.memory_space<vmem>>, vector<8x16xf32>
    tpu.vector_store %arg3[%c0_86, %c0_87], %335 {strides = array<i32>} : memref<8x16xf32, #tpu.memory_space<vmem>>, vector<8x16xf32>,
    return
  }
}

</mosaic_0001>

<bundles_post_ra>
// kernel: tpu_custom_call.1
= control target key start
LH: loop header
LB: loop body
LE: loop exit
PB: predicated region body
PF: predicated region fallthrough
CT: control target
= control target key end

     0   :  { %v16_v1 = vlaneseq  ;;  %v1762_v2 = vmov 0.0   ;;  %vm1763_vm0 = vmmov 0   ;;  %s2312_s0 = inlined_call_operand.vmem [shape: f32[8,8], index: 0, kind: input, shape index: {}]   ;;  %s2313_s1 = inlined_call_operand.vmem [shape: f32[4,136,64], index: 1, kind: input, shape index: {}]   ;;  %s2314_s2 = inlined_call_operand.vmem [shape: f32[4,8,64], index: 2, kind: input, shape index: {}]   ;;  %s2315_s3 = inlined_call_operand.hbm [shape: f32[8,16], index: 3, kind: output, shape index: {}]  }
   0x1   :  { %v19_v0 = vld [vmem:[%s2313_s1] sm:$0xff]  ;;  %1516 = vmatprep.subr.mxu0 %v1762_v2  ;;  %1518 = vmatprep.mubr.msk.f32.mxu0 %vm1763_vm0, %v1762_v2 }
   0x2   :  { %8 = vsyncpa [#allocation3], 0  ;;  %1517 = vmatpush3.msra.mxu0 %v19_v0  ;;  %v1792_v3 = vshrl.u32 %v16_v1, 7  ;;  %1521 = vmatprep.subr.mxu1 %v1762_v2  ;;  %v1798_v4 = vld [vmem:[%s2314_s2] sm:$0xff]  ;;  %vm47_vm1 = vcmask 64512   ;;  %v26_v10 = vld [vmem:[%s2313_s1 + $0x38] sm:$0xff] }
   0x3   :  { %1537 = vmatprep.mubr.msk.f32.mxu1 %vm1763_vm0, %v1762_v2  ;;  %1540 = vmatprep.subr.mxu0 %v1762_v2  ;;  %v1809_v6 = vld [vmem:[%s2312_s0] sm:$0xff]  ;;  %v25_v11 = vld [vmem:[%s2313_s1 + $0x30] sm:$0xff]  ;;  %v24_v12 = vld [vmem:[%s2313_s1 + $0x28] sm:$0xff]  ;;  %v1857_v22 = vand.u32 127, %v16_v1  ;;  %vm128_vm3 = vcmask 523264   ;;  %s1764_s21 = smov 120  }
   0x4   :  { %v1804_v5 = vsub.s32 3, %v1792_v3  ;;  %v27_v9 = vld [vmem:[%s2313_s1 + $0x40] sm:$0xff]  ;;  %v22_v14 = vld [vmem:[%s2313_s1 + $0x18] sm:$0xff]  ;;  %v21_v15 = vld [vmem:[%s2313_s1 + $0x10] sm:$0xff]  ;;  %v1853_v17 = vsub.s32 0, %v1792_v3  ;;  %v1898_v34 = vsub.s32 1, %v1792_v3 }
   0x5   :  { %1522 = vmatpush3.msra.mxu1 %v27_v9  ;;  %v23_v13 = vld [vmem:[%s2313_s1 + $0x20] sm:$0xff]  ;;  %v20_v16 = vld [vmem:[%s2313_s1 + $0x8] sm:$0xff]  ;;  %vm18_vm2 = vcmp.lt.s32.totalorder %v1857_v22, 32  ;;  %v34_v27 = vld [vmem:[%s2313_s1 + $0x78] sm:$0xff]  ;;  %v1908_v42 = vsub.s32 2, %v1792_v3  ;;  %v37_v50 = vsub.f32 1.0, %v1798_v4 }
   0x6   :  { %v41_v7 = vrot.slane %v1798_v4, %v1804_v5  ;;  %1523 = vmatprep.subr.mxu1 %v1762_v2  ;;  %v46_v18 = vrot.slane %v1798_v4, %v1853_v17  ;;  %v35_v26 = vld [vmem:[%s2313_s1 + $0x80] sm:$0xff]  ;;  %v33_v28 = vld [vmem:[%s2313_s1 + $0x70] sm:$0xff]  ;;  %v32_v29 = vld [vmem:[%s2313_s1 + $0x68] sm:$0xff]  ;;  %v127_v35 = vrot.slane %v1798_v4, %v1898_v34  ;;  %vm341_vm4 = vcmask 57344   ;;  %s1765_s22 = smov [#allocation2]  }
   0x7   :  { %1524 = vmatpush3.msra.mxu1 %v26_v10  ;;  %v31_v30 = vld [vmem:[%s2313_s1 + $0x60] sm:$0xff]  ;;  %v30_v31 = vld [vmem:[%s2313_s1 + $0x58] sm:$0xff]  ;;  %v29_v32 = vld [vmem:[%s2313_s1 + $0x50] sm:$0xff]  ;;  %v208_v43 = vrot.slane %v1798_v4, %v1908_v42  ;;  %v1923_v52 = vrot.slane %v37_v50, %v1804_v5  ;;  %s1362_s23 = sshll.u32 %s1765_s22, 4  ;;  %vm1354_vm5 = vcmask 130048   ;;  %s1363_s23 = int_to_ptr.vmem [resolvable:$true] %s1362_s23 }
   0x8   :  { %v1814_v8 = vmul.f32 %v41_v7, %v1809_v6  ;;  %1525 = vmatprep.subr.mxu1 %v1762_v2  ;;  %v28_v33 = vld [vmem:[%s2313_s1 + $0x48] sm:$0xff]  ;;  %v1386_v50 = vld [vmem:[%s2313_s1 + $0xf0] sm:$0xff]  ;;  %s1740_s24 = scalar_lea.vmem %s1363_s23, 128  ;;  %p1745_p1 = scmp.lt.s32.totalorder %s1363_s23, %s1363_s23 }
   0x9   :  { %1526 = vmatpush3.msra.mxu1 %v25_v11  ;;  %v1373_v47 = vld [vmem:[%s2313_s1 + $0x88] sm:$0xff]  ;;  %p1741_p0 = scmp.ne.s32.totalorder %s1363_s23, %s1740_s24  ;;  %p1746_p2 = scmp.lt.s32.totalorder %s1740_s24, %s1740_s24 }
   0xa   :  { %1519 = vmatmul.mubr.msk.f32.vlgmr.msra.gmra.mxu0 %vm47_vm1, %v1814_v8  ;;  %1527 = vmatprep.subr.mxu1 %v1762_v2 }
   0xb   :  { %1556 = vmatprep.mubr.msk.f32.mxu0 %vm1763_vm0, %v1762_v2  ;;  %1528 = vmatpush3.msra.mxu1 %v24_v12  ;;  %p1747_p3 = por %p1746_p2, %p1745_p1 }
   0xc   :  { %1529 = vmatprep.subr.mxu1 %v1762_v2  ;;  %1541 = vmatpush3.msra.mxu0 %v35_v26 }
   0xd   :  { %1530 = vmatpush3.msra.mxu1 %v23_v13  ;;  %1542 = vmatprep.subr.mxu0 %v1762_v2  ;;  %p1748_p4 = pnand %p1747_p3, %p1741_p0 }
   0xe   :  { %1531 = vmatprep.subr.mxu1 %v1762_v2  ;;  %1543 = vmatpush3.msra.mxu0 %v34_v27 }
   0xf   :  { %1532 = vmatpush3.msra.mxu1 %v22_v14  ;;  %1544 = vmatprep.subr.mxu0 %v1762_v2 }
  0x10   :  { %1533 = vmatprep.subr.mxu1 %v1762_v2  ;;  %1545 = vmatpush3.msra.mxu0 %v33_v28 }
  0x11   :  { %1534 = vmatpush3.msra.mxu1 %v21_v15  ;;  %1546 = vmatprep.subr.mxu0 %v1762_v2 }
  0x12   :  { %1535 = vmatprep.subr.mxu1 %v1762_v2  ;;  %1547 = vmatpush3.msra.mxu0 %v32_v29 }
  0x13   :  { %1536 = vmatpush3.msra.mxu1 %v20_v16  ;;  %1548 = vmatprep.subr.mxu0 %v1762_v2 }
  0x14   :  { %1559 = vmatprep.subr.mxu1 %v1762_v2  ;;  %1549 = vmatpush3.msra.mxu0 %v31_v30  ;;  %v1380_v30 = vld [vmem:[%s2313_s1 + $0xc0] sm:$0xff] }
  0x15   :  { %1550 = vmatprep.subr.mxu0 %v1762_v2 }
  0x16   :  { %1551 = vmatpush3.msra.mxu0 %v30_v31  ;;  %v1379_v31 = vld [vmem:[%s2313_s1 + $0xb8] sm:$0xff] }
  0x17   :  { %1552 = vmatprep.subr.mxu0 %v1762_v2 }
  0x18   :  { %1553 = vmatpush3.msra.mxu0 %v29_v32  ;;  %v1378_v32 = vld [vmem:[%s2313_s1 + $0xb0] sm:$0xff] }
  0x19   :  { %1554 = vmatprep.subr.mxu0 %v1762_v2 }
  0x1a   :  { %1555 = vmatpush3.msra.mxu0 %v28_v33  ;;  %v1377_v33 = vld [vmem:[%s2313_s1 + $0xa8] sm:$0xff] }
  0x1b   :  { %1564 = vmatprep.subr.mxu0 %v1762_v2 }
  0xca   :  { %v117_v19 = vpop.f32.mrf.mxu0 }
  0xcb   :  { %v118_v20 = vadd.f32 %v117_v19, %v46_v18  ;;  %v1934_v18 = vsub.s32 4, %v1792_v3 }
  0xcc   :  { %v1520_v21 = vpop.f32.mrf.mxu0 }
  0xcd   :  { %1700 = vtanh.f32 %v118_v20  ;;  %v122_v23 = vmax.f32 %v118_v20, 0.0  ;;  %v324_v19 = vrot.slane %v1798_v4, %v1934_v18  ;;  %v1939_v20 = vsub.s32 6, %v1792_v3  ;;  %v1944_v21 = vld [vmem:[%s2314_s2 + $0x8] sm:$0xff] }
  0xce   :  { %v378_v27 = vrot.slane %v1944_v21, %v1804_v5  ;;  %v1381_v3 = vld [vmem:[%s2313_s1 + $0xc8] sm:$0xff] }
  0xda   :  { %v1701_v24 = vpop.eup %1700 }
  0xdb   :  { %v123_v25 = vsel %vm18_vm2, %v1701_v24, %v122_v23  ;;  %v332_v24 = vrot.slane %v1798_v4, %v1939_v20 }
  0xdc   :  { %1538 = vmatmul.mubr.msk.f32.vlgmr.msra.gmra.mxu1 %vm128_vm3, %v123_v25 }
  0xdd   :  { %1561 = vmatprep.mubr.msk.f32.mxu1 %vm1763_vm0, %v1762_v2  ;;  %1560 = vmatpush3.msra.mxu1 %v1373_v47  ;;  %v1389_v47 = vld [vmem:[%s2313_s1 + $0x108] sm:$0xff] }
  0xde   :  { %1583 = vmatprep.subr.mxu1 %v1762_v2 }
 0x19c   :  { %v198_v36 = vpop.f32.mrf.mxu1 }
 0x19d   :  { %v199_v37 = vadd.f32 %v198_v36, %v127_v35  ;;  %v1376_v35 = vld [vmem:[%s2313_s1 + $0xa0] sm:$0xff]  ;;  %v1375_v36 = vld [vmem:[%s2313_s1 + $0x98] sm:$0xff] }
 0x19e   :  { %v1539_v38 = vpop.f32.mrf.mxu1 }
 0x19f   :  { %1702 = vtanh.f32 %v199_v37  ;;  %v203_v39 = vmax.f32 %v199_v37, 0.0  ;;  %v1374_v37 = vld [vmem:[%s2313_s1 + $0x90] sm:$0xff]  ;;  %v383_v38 = vrot.slane %v1944_v21, %v1853_v17 }
 0x1ac   :  { %v1703_v40 = vpop.eup %1702 }
 0x1ad   :  { %v204_v41 = vsel %vm18_vm2, %v1703_v40, %v203_v39 }
 0x1ae   :  { %1557 = vmatmul.mubr.msk.f32.vlgmr.msra.gmra.mxu0 %vm128_vm3, %v204_v41 }
 0x1af   :  { %1580 = vmatprep.mubr.msk.f32.mxu0 %vm1763_vm0, %v1762_v2  ;;  %1565 = vmatpush3.msra.mxu0 %v1381_v3 }
 0x1b0   :  { %1566 = vmatprep.subr.mxu0 %v1762_v2 }
 0x1b1   :  { %1567 = vmatpush3.msra.mxu0 %v1380_v30 }
 0x1b2   :  { %1568 = vmatprep.subr.mxu0 %v1762_v2 }
 0x1b3   :  { %1569 = vmatpush3.msra.mxu0 %v1379_v31 }
 0x1b4   :  { %1570 = vmatprep.subr.mxu0 %v1762_v2 }
 0x1b5   :  { %1571 = vmatpush3.msra.mxu0 %v1378_v32 }
 0x1b6   :  { %1572 = vmatprep.subr.mxu0 %v1762_v2 }
 0x1b7   :  { %1573 = vmatpush3.msra.mxu0 %v1377_v33 }
 0x1b8   :  { %1574 = vmatprep.subr.mxu0 %v1762_v2 }
 0x1b9   :  { %1575 = vmatpush3.msra.mxu0 %v1376_v35 }
 0x1ba   :  { %1576 = vmatprep.subr.mxu0 %v1762_v2 }
 0x1bb   :  { %1577 = vmatpush3.msra.mxu0 %v1375_v36 }
 0x1bc   :  { %1578 = vmatprep.subr.mxu0 %v1762_v2 }
 0x1bd   :  { %1579 = vmatpush3.msra.mxu0 %v1374_v37 }
 0x1be   :  { %1602 = vmatprep.subr.mxu0 %v1762_v2 }
 0x26e   :  { %v278_v44 = vpop.f32.mrf.mxu0 }
 0x26f   :  { %v1912_v45 = vadd.f32 %v278_v44, %v208_v43 }
 0x270   :  { %v1558_v46 = vpop.f32.mrf.mxu0 }
 0x271   :  { %283 = vrot.lane.b32.xlu0 %v1912_v45, %s1764_s21  ;;  %v292_v48 = vsub.f32 0.0, %v1912_v45 }
 0x273   :  { %v293_v49 = vmul.f32 1.442695, %v292_v48  ;;  %v1388_v48 = vld [vmem:[%s2313_s1 + $0x100] sm:$0xff] }
 0x275   :  { %1704 = vpow2.f32 %v293_v49  ;;  %v1387_v49 = vld [vmem:[%s2313_s1 + $0xf8] sm:$0xff] }
 0x282   :  { %v1705_v55 = vpop.eup %1704 }
 0x2e3   :  { %v284_v51 = vpop.permute.xlu0 %283 }
 0x2e4   :  { %v286_v53 = vsub.f32 %v1809_v6, %v284_v51  ;;  %v1385_v51 = vld [vmem:[%s2313_s1 + $0xe8] sm:$0xff] }
 0x2e6   :  { %v291_v54 = vmul.f32 %v1923_v52, %v286_v53  ;;  %v1384_v53 = vld [vmem:[%s2313_s1 + $0xe0] sm:$0xff] }
 0x2e8   :  { %v295_v56 = vmul.f32 %v1705_v55, %v291_v54  ;;  %v1383_v54 = vld [vmem:[%s2313_s1 + $0xd8] sm:$0xff]  ;;  %v1382_v55 = vld [vmem:[%s2313_s1 + $0xd0] sm:$0xff] }
 0x2ea   :  { %v296_v57 = vadd.f32 %v295_v56, %v1814_v8  ;;  %v463_v56 = vrot.slane %v1944_v21, %v1898_v34 }
 0x2ec   :  { %v302_v58 = vsel %vm47_vm1, %v296_v57, 0.0 }
 0x2ed   :  { %v303_v59 = vrot.slane %v302_v58, 4 }
 0x2ef   :  { %v304_v60 = vadd.f32 %v303_v59, %v302_v58 }
 0x2f1   :  { %v305_v61 = vrot.slane %v304_v60, 2 }
 0x2f3   :  { %v306_v62 = vadd.f32 %v305_v61, %v304_v60 }
 0x2f5   :  { %v307_v63 = vrot.slane %v306_v62, 1 }
 0x2f7   :  { %v308_v0 = vadd.f32 %v307_v63, %v306_v62  ;;  %v543_v63 = vrot.slane %v1944_v21, %v1908_v42 }
 0x2f9   :  { %v310_v1 = vmul.f32 0.125, %v308_v0 }
 0x2fb   :  { %v311_v7 = vsub.f32 %v296_v57, %v310_v1 }
 0x2fd   :  { %v312_v9 = vmul.f32 %v311_v7, %v311_v7  ;;  %v325_v23 = vmul.f32 %v324_v19, %v311_v7 }
 0x2ff   :  { %v313_v10 = vsel %vm47_vm1, %v312_v9, 0.0 }
 0x300   :  { %v314_v6 = vrot.slane %v313_v10, 4 }
 0x302   :  { %v315_v11 = vadd.f32 %v314_v6, %v313_v10 }
 0x304   :  { %v316_v12 = vrot.slane %v315_v11, 2 }
 0x306   :  { %v317_v13 = vadd.f32 %v316_v12, %v315_v11 }
 0x308   :  { %v318_v14 = vrot.slane %v317_v13, 1 }
 0x30a   :  { %v319_v15 = vadd.f32 %v318_v14, %v317_v13  ;;  %v1394_v14 = vld [vmem:[%s2313_s1 + $0x110] sm:$0xff] }
 0x30c   :  { %v320_v8 = vmul.f32 0.125, %v319_v15 }
 0x30e   :  { %v1930_v16 = vadd.f32 1e-05, %v320_v8 }
 0x310   :  { %1706 = vrsqrt.f32 %v1930_v16 }
 0x31d   :  { %v1707_v25 = vpop.eup %1706 }
 0x31e   :  { %v328_v26 = vmul.f32 %v1707_v25, %v325_v23 }
 0x320   :  { %v1950_v28 = vadd.f32 %v332_v24, %v328_v26 }
 0x322   :  { %v1953_v29 = vmul.f32 %v378_v27, %v1950_v28 }
 0x324   :  { %1562 = vmatmul.mubr.msk.f32.vlgmr.msra.gmra.mxu1 %vm47_vm1, %v1953_v29 }
 0x325   :  { %1599 = vmatprep.mubr.msk.f32.mxu1 %vm1763_vm0, %v1762_v2  ;;  %1584 = vmatpush3.msra.mxu1 %v1389_v47 }
 0x326   :  { %1585 = vmatprep.subr.mxu1 %v1762_v2 }
 0x327   :  { %1586 = vmatpush3.msra.mxu1 %v1388_v48 }
 0x328   :  { %1587 = vmatprep.subr.mxu1 %v1762_v2 }
 0x329   :  { %1588 = vmatpush3.msra.mxu1 %v1387_v49  ;;  %v658_v49 = vrot.slane %v1944_v21, %v1934_v18 }
 0x32a   :  { %1589 = vmatprep.subr.mxu1 %v1762_v2 }
 0x32b   :  { %1590 = vmatpush3.msra.mxu1 %v1386_v50 }
 0x32c   :  { %1591 = vmatprep.subr.mxu1 %v1762_v2 }
 0x32d   :  { %1592 = vmatpush3.msra.mxu1 %v1385_v51 }
 0x32e   :  { %1593 = vmatprep.subr.mxu1 %v1762_v2 }
 0x32f   :  { %1594 = vmatpush3.msra.mxu1 %v1384_v53  ;;  %v2068_v53 = vld [vmem:[%s2314_s2 + $0x10] sm:$0xff] }
 0x330   :  { %1595 = vmatprep.subr.mxu1 %v1762_v2 }
 0x331   :  { %1596 = vmatpush3.msra.mxu1 %v1383_v54 }
 0x332   :  { %1597 = vmatprep.subr.mxu1 %v1762_v2 }
 0x333   :  { %1598 = vmatpush3.msra.mxu1 %v1382_v55 }
 0x334   :  { %1607 = vmatprep.subr.mxu1 %v1762_v2 }
 0x3e4   :  { %v453_v39 = vpop.f32.mrf.mxu1 }
 0x3e5   :  { %v454_v40 = vadd.f32 %v453_v39, %v383_v38 }
 0x3e6   :  { %v1563_v41 = vpop.f32.mrf.mxu1 }
 0x3e7   :  { %1708 = vtanh.f32 %v454_v40  ;;  %v458_v43 = vmax.f32 %v454_v40, 0.0 }
 0x3f4   :  { %v1709_v44 = vpop.eup %1708 }
 0x3f5   :  { %v459_v46 = vsel %vm18_vm2, %v1709_v44, %v458_v43 }
 0x3f6   :  { %1581 = vmatmul.mubr.msk.f32.vlgmr.msra.gmra.mxu0 %vm128_vm3, %v459_v46 }
 0x3f7   :  { %1604 = vmatprep.mubr.msk.f32.mxu0 %vm1763_vm0, %v1762_v2  ;;  %1603 = vmatpush3.msra.mxu0 %v1394_v14  ;;  %v1396_v14 = vld [vmem:[%s2313_s1 + $0x120] sm:$0xff] }
 0x3f8   :  { %1626 = vmatprep.subr.mxu0 %v1762_v2 }
 0x4b6   :  { %v533_v57 = vpop.f32.mrf.mxu0 }
 0x4b7   :  { %v534_v58 = vadd.f32 %v533_v57, %v463_v56  ;;  %v666_v56 = vrot.slane %v1944_v21, %v1939_v20 }
 0x4b8   :  { %v1582_v59 = vpop.f32.mrf.mxu0 }
 0x4b9   :  { %1710 = vtanh.f32 %v534_v58  ;;  %v538_v60 = vmax.f32 %v534_v58, 0.0 }
 0x4ba   :  { %1712 = vlog2.f32 %v1930_v16  ;;  %v374_v16 = vsub.f32 1.0, %v1944_v21 }
 0x4c6   :  { %v1711_v61 = vpop.eup %1710 }
 0x4c7   :  { %v539_v62 = vsel %vm18_vm2, %v1711_v61, %v538_v60  ;;  %v1713_v9 = vpop.eup %1712  ;;  %v711_v60 = vrot.slane %v2068_v53, %v1804_v5 }
 0x4c8   :  { %1600 = vmatmul.mubr.msk.f32.vlgmr.msra.gmra.mxu1 %vm128_vm3, %v539_v62  ;;  %v335_v10 = vmul.f32 0.6931472, %v1713_v9  ;;  %v1402_v9 = vld [vmem:[%s2313_s1 + $0x150] sm:$0xff] }
 0x4c9   :  { %1623 = vmatprep.mubr.msk.f32.mxu1 %vm1763_vm0, %v1762_v2  ;;  %1608 = vmatpush3.msra.mxu1 %v1402_v9 }
 0x4ca   :  { %v336_v6 = vmul.f32 0.5, %v335_v10  ;;  %v1401_v10 = vld [vmem:[%s2313_s1 + $0x148] sm:$0xff]  ;;  %1609 = vmatprep.subr.mxu1 %v1762_v2 }
 0x4cb   :  { %1610 = vmatpush3.msra.mxu1 %v1401_v10 }
 0x4cc   :  { %v337_v11 = vsub.f32 %v1798_v4, %v336_v6  ;;  %v2053_v4 = vrot.slane %v374_v16, %v1804_v5  ;;  %v1400_v6 = vld [vmem:[%s2313_s1 + $0x140] sm:$0xff]  ;;  %1611 = vmatprep.subr.mxu1 %v1762_v2 }
 0x4cd   :  { %1612 = vmatpush3.msra.mxu1 %v1400_v6 }
 0x4ce   :  { %v339_v12 = vrot.slane %v337_v11, 5  ;;  %v1399_v11 = vld [vmem:[%s2313_s1 + $0x138] sm:$0xff]  ;;  %1613 = vmatprep.subr.mxu1 %v1762_v2 }
 0x4cf   :  { %1614 = vmatpush3.msra.mxu1 %v1399_v11 }
 0x4d0   :  { %v342_v13 = vsel %vm341_vm4, %v339_v12, 0.0  ;;  %v1398_v12 = vld [vmem:[%s2313_s1 + $0x130] sm:$0xff]  ;;  %1615 = vmatprep.subr.mxu1 %v1762_v2 }
 0x4d1   :  { %1616 = vmatpush3.msra.mxu1 %v1398_v12 }
 0x4d2   :  { %1617 = vmatprep.subr.mxu1 %v1762_v2 }
 0x588   :  { %v613_v0 = vpop.f32.mrf.mxu1 }
 0x589   :  { %v2039_v1 = vadd.f32 %v613_v0, %v543_v63 }
 0x58a   :  { %v1601_v7 = vpop.f32.mrf.mxu1 }
 0x58b   :  { %618 = vrot.lane.b32.xlu0 %v2039_v1, %s1764_s21  ;;  %v627_v15 = vsub.f32 0.0, %v2039_v1 }
 0x58d   :  { %v628_v8 = vmul.f32 1.442695, %v627_v15  ;;  %v1395_v15 = vld [vmem:[%s2313_s1 + $0x118] sm:$0xff] }
 0x58f   :  { %1714 = vpow2.f32 %v628_v8  ;;  %v716_v8 = vrot.slane %v2068_v53, %v1853_v17 }
 0x59c   :  { %v1715_v25 = vpop.eup %1714 }
 0x5aa   :  { %343 = vadd.xlane.f32.xlu0 %v342_v13  ;;  %v1397_v13 = vld [vmem:[%s2313_s1 + $0x128] sm:$0xff] }
 0x5ab   :  { %1618 = vmatpush3.msra.mxu1 %v1397_v13 }
 0x5ac   :  { %1619 = vmatprep.subr.mxu1 %v1762_v2 }
 0x5ad   :  { %1620 = vmatpush3.msra.mxu1 %v1396_v14 }
 0x5ae   :  { %1621 = vmatprep.subr.mxu1 %v1762_v2 }
 0x5af   :  { %1622 = vmatpush3.msra.mxu1 %v1395_v15 }
 0x5b0   :  { %1645 = vmatprep.subr.mxu1 %v1762_v2 }
 0x5fd   :  { %v619_v19 = vpop.permute.xlu0 %618 }
 0x5fe   :  { %v621_v23 = vsub.f32 %v1950_v28, %v619_v19 }
 0x600   :  { %v626_v24 = vmul.f32 %v2053_v4, %v621_v23 }
 0x602   :  { %v630_v26 = vmul.f32 %v1715_v25, %v626_v24 }
 0x604   :  { %v631_v27 = vadd.f32 %v630_v26, %v1953_v29 }
 0x606   :  { %v637_v3 = vsel %vm47_vm1, %v631_v27, 0.0 }
 0x607   :  { %v638_v30 = vrot.slane %v637_v3, 4 }
 0x609   :  { %v639_v31 = vadd.f32 %v638_v30, %v637_v3  ;;  %v1409_v3 = vld [vmem:[%s2313_s1 + $0x188] sm:$0xff]  ;;  %v1408_v30 = vld [vmem:[%s2313_s1 + $0x180] sm:$0xff] }
 0x60b   :  { %v640_v32 = vrot.slane %v639_v31, 2 }
 0x60d   :  { %v641_v33 = vadd.f32 %v640_v32, %v639_v31  ;;  %v1407_v31 = vld [vmem:[%s2313_s1 + $0x178] sm:$0xff]  ;;  %v1406_v32 = vld [vmem:[%s2313_s1 + $0x170] sm:$0xff] }
 0x60f   :  { %v642_v35 = vrot.slane %v641_v33, 1 }
 0x611   :  { %v643_v36 = vadd.f32 %v642_v35, %v641_v33  ;;  %v1405_v33 = vld [vmem:[%s2313_s1 + $0x168] sm:$0xff]  ;;  %v1404_v35 = vld [vmem:[%s2313_s1 + $0x160] sm:$0xff] }
 0x613   :  { %v644_v37 = vmul.f32 0.125, %v643_v36  ;;  %v1403_v36 = vld [vmem:[%s2313_s1 + $0x158] sm:$0xff] }
 0x615   :  { %v645_v38 = vsub.f32 %v631_v27, %v644_v37  ;;  %v1410_v27 = vld [vmem:[%s2313_s1 + $0x190] sm:$0xff]  ;;  %v796_v37 = vrot.slane %v2068_v53, %v1898_v34 }
 0x617   :  { %v646_v39 = vmul.f32 %v645_v38, %v645_v38  ;;  %v659_v54 = vmul.f32 %v658_v49, %v645_v38  ;;  %v1415_v49 = vld [vmem:[%s2313_s1 + $0x198] sm:$0xff] }
 0x619   :  { %v647_v40 = vsel %vm47_vm1, %v646_v39, 0.0 }
 0x61a   :  { %v648_v28 = vrot.slane %v647_v40, 4 }
 0x61c   :  { %v649_v41 = vadd.f32 %v648_v28, %v647_v40 }
 0x61e   :  { %v650_v43 = vrot.slane %v649_v41, 2 }
 0x620   :  { %v651_v44 = vadd.f32 %v650_v43, %v649_v41 }
 0x622   :  { %v652_v46 = vrot.slane %v651_v44, 1 }
 0x624   :  { %v653_v47 = vadd.f32 %v652_v46, %v651_v44  ;;  %v876_v44 = vrot.slane %v2068_v53, %v1908_v42 }
 0x626   :  { %v654_v29 = vmul.f32 0.125, %v653_v47 }
 0x628   :  { %v2060_v48 = vadd.f32 1e-05, %v654_v29 }
 0x62a   :  { %1716 = vrsqrt.f32 %v2060_v48 }
 0x633   :  { %v344_v50 = vpop.xlane.xlu0 %343 }
 0x634   :  { %v345_v51 = vrot.slane %v344_v50, 4 }
 0x636   :  { %v346_v55 = vadd.f32 %v345_v51, %v344_v50 }
 0x637   :  { %v1717_v57 = vpop.eup %1716 }
 0x638   :  { %v662_v58 = vmul.f32 %v1717_v57, %v659_v54  ;;  %v347_v59 = vrot.slane %v346_v55, 2  ;;  %v707_v54 = vsub.f32 1.0, %v2068_v53 }
 0x63a   :  { %v2074_v61 = vadd.f32 %v666_v56, %v662_v58  ;;  %v348_v62 = vadd.f32 %v347_v59, %v346_v55  ;;  %v2174_v56 = vrot.slane %v707_v54, %v1804_v5  ;;  %v1416_v54 = vld [vmem:[%s2313_s1 + $0x1a0] sm:$0xff] }
 0x63c   :  { %v2077_v63 = vmul.f32 %v711_v60, %v2074_v61  ;;  %v349_v0 = vrot.slane %v348_v62, 1 }
 0x63e   :  { %1605 = vmatmul.mubr.msk.f32.vlgmr.msra.gmra.mxu0 %vm47_vm1, %v2077_v63  ;;  %v350_v7 = vadd.f32 %v349_v0, %v348_v62 }
 0x63f   :  { %1642 = vmatprep.mubr.msk.f32.mxu0 %vm1763_vm0, %v1762_v2  ;;  %1627 = vmatpush3.msra.mxu0 %v1410_v27  ;;  %v991_v27 = vrot.slane %v2068_v53, %v1934_v18 }
 0x640   :  { %1688 = vpush %v350_v7  ;;  %1628 = vmatprep.subr.mxu0 %v1762_v2 }
 0x641   :  { %1629 = vmatpush3.msra.mxu0 %v1409_v3  ;;  %v2186_v3 = vld [vmem:[%s2314_s2 + $0x18] sm:$0xff] }
 0x642   :  { %1630 = vmatprep.subr.mxu0 %v1762_v2 }
 0x643   :  { %1631 = vmatpush3.msra.mxu0 %v1408_v30 }
 0x644   :  { %1632 = vmatprep.subr.mxu0 %v1762_v2 }
 0x645   :  { %1633 = vmatpush3.msra.mxu0 %v1407_v31  ;;  %v999_v31 = vrot.slane %v2068_v53, %v1939_v20 }
 0x646   :  { %1634 = vmatprep.subr.mxu0 %v1762_v2 }
 0x647   :  { %1635 = vmatpush3.msra.mxu0 %v1406_v32 }
 0x648   :  { %1636 = vmatprep.subr.mxu0 %v1762_v2 }
 0x649   :  { %1637 = vmatpush3.msra.mxu0 %v1405_v33 }
 0x64a   :  { %1638 = vmatprep.subr.mxu0 %v1762_v2 }
 0x64b   :  { %1639 = vmatpush3.msra.mxu0 %v1404_v35 }
 0x64c   :  { %1640 = vmatprep.subr.mxu0 %v1762_v2 }
 0x64d   :  { %1641 = vmatpush3.msra.mxu0 %v1403_v36  ;;  %v1044_v36 = vrot.slane %v2186_v3, %v1804_v5 }
 0x64e   :  { %1650 = vmatprep.subr.mxu0 %v1762_v2 }
 0x6fe   :  { %v786_v16 = vpop.f32.mrf.mxu0 }
 0x6ff   :  { %v787_v19 = vadd.f32 %v786_v16, %v716_v8 }
 0x700   :  { %v1606_v23 = vpop.f32.mrf.mxu0 }
 0x701   :  { %1718 = vtanh.f32 %v787_v19  ;;  %v791_v24 = vmax.f32 %v787_v19, 0.0 }
 0x70e   :  { %v1719_v25 = vpop.eup %1718 }
 0x70f   :  { %v792_v26 = vsel %vm18_vm2, %v1719_v25, %v791_v24 }
 0x710   :  { %1624 = vmatmul.mubr.msk.f32.vlgmr.msra.gmra.mxu1 %vm128_vm3, %v792_v26 }
 0x711   :  { %1647 = vmatprep.mubr.msk.f32.mxu1 %vm1763_vm0, %v1762_v2  ;;  %1646 = vmatpush3.msra.mxu1 %v1415_v49  ;;  %v1419_v49 = vld [vmem:[%s2313_s1 + $0x1b8] sm:$0xff] }
 0x712   :  { %1669 = vmatprep.subr.mxu1 %v1762_v2 }
 0x7d0   :  { %v866_v38 = vpop.f32.mrf.mxu1 }
 0x7d1   :  { %v867_v39 = vadd.f32 %v866_v38, %v796_v37 }
 0x7d2   :  { %v1625_v40 = vpop.f32.mrf.mxu1 }
 0x7d3   :  { %1720 = vtanh.f32 %v867_v39  ;;  %v871_v28 = vmax.f32 %v867_v39, 0.0 }
 0x7e0   :  { %v1721_v41 = vpop.eup %1720 }
 0x7e1   :  { %v872_v43 = vsel %vm18_vm2, %v1721_v41, %v871_v28 }
 0x7e2   :  { %1643 = vmatmul.mubr.msk.f32.vlgmr.msra.gmra.mxu0 %vm128_vm3, %v872_v43 }
 0x7e3   :  { %1666 = vmatprep.mubr.msk.f32.mxu0 %vm1763_vm0, %v1762_v2 }
 0x8a2   :  { %v946_v46 = vpop.f32.mrf.mxu0 }
 0x8a3   :  { %v2163_v47 = vadd.f32 %v946_v46, %v876_v44  ;;  %v1423_v44 = vld [vmem:[%s2313_s1 + $0x1d8] sm:$0xff]  ;;  %v1422_v46 = vld [vmem:[%s2313_s1 + $0x1d0] sm:$0xff] }
 0x8a4   :  { %v1644_v29 = vpop.f32.mrf.mxu0  ;;  %1651 = vmatpush3.msra.mxu0 %v1423_v44 }
 0x8a5   :  { %951 = vrot.lane.b32.xlu1 %v2163_v47, %s1764_s21  ;;  %v960_v50 = vsub.f32 0.0, %v2163_v47  ;;  %1652 = vmatprep.subr.mxu0 %v1762_v2  ;;  %v1420_v29 = vld [vmem:[%s2313_s1 + $0x1c0] sm:$0xff] }
 0x8a6   :  { %1653 = vmatpush3.msra.mxu0 %v1422_v46 }
 0x8a7   :  { %v961_v51 = vmul.f32 1.442695, %v960_v50  ;;  %1654 = vmatprep.subr.mxu0 %v1762_v2  ;;  %v1418_v50 = vld [vmem:[%s2313_s1 + $0x1b0] sm:$0xff] }
 0x8a9   :  { %1722 = vpow2.f32 %v961_v51  ;;  %v1417_v51 = vld [vmem:[%s2313_s1 + $0x1a8] sm:$0xff] }
 0x8b6   :  { %v1723_v59 = vpop.eup %1722 }
 0x917   :  { %v952_v55 = vpop.permute.xlu1 %951 }
 0x918   :  { %v954_v57 = vsub.f32 %v2074_v61, %v952_v55  ;;  %v1049_v55 = vrot.slane %v2186_v3, %v1853_v17  ;;  %v1429_v17 = vld [vmem:[%s2313_s1 + $0x208] sm:$0xff] }
 0x91a   :  { %v959_v58 = vmul.f32 %v2174_v56, %v954_v57 }
 0x91c   :  { %v963_v60 = vmul.f32 %v1723_v59, %v959_v58 }
 0x91e   :  { %v964_v62 = vadd.f32 %v963_v60, %v2077_v63 }
 0x920   :  { %v970_v0 = vsel %vm47_vm1, %v964_v62, 0.0 }
 0x921   :  { %v971_v7 = vrot.slane %v970_v0, 4 }
 0x923   :  { %v972_v9 = vadd.f32 %v971_v7, %v970_v0  ;;  %v1431_v7 = vld [vmem:[%s2313_s1 + $0x218] sm:$0xff] }
 0x925   :  { %v973_v10 = vrot.slane %v972_v9, 2 }
 0x927   :  { %v974_v6 = vadd.f32 %v973_v10, %v972_v9  ;;  %v1430_v9 = vld [vmem:[%s2313_s1 + $0x210] sm:$0xff]  ;;  %v1428_v10 = vld [vmem:[%s2313_s1 + $0x200] sm:$0xff] }
 0x929   :  { %v975_v11 = vrot.slane %v974_v6, 1 }
 0x92b   :  { %v976_v12 = vadd.f32 %v975_v11, %v974_v6  ;;  %v1427_v6 = vld [vmem:[%s2313_s1 + $0x1f8] sm:$0xff]  ;;  %v1426_v11 = vld [vmem:[%s2313_s1 + $0x1f0] sm:$0xff] }
 0x92d   :  { %v977_v13 = vmul.f32 0.125, %v976_v12  ;;  %v1425_v12 = vld [vmem:[%s2313_s1 + $0x1e8] sm:$0xff] }
 0x92f   :  { %v978_v14 = vsub.f32 %v964_v62, %v977_v13  ;;  %v1424_v13 = vld [vmem:[%s2313_s1 + $0x1e0] sm:$0xff] }
 0x931   :  { %v979_v15 = vmul.f32 %v978_v14, %v978_v14  ;;  %v992_v30 = vmul.f32 %v991_v27, %v978_v14  ;;  %v1129_v14 = vrot.slane %v2186_v3, %v1898_v34 }
 0x933   :  { %v980_v8 = vsel %vm47_vm1, %v979_v15, 0.0 }
 0x934   :  { %v981_v61 = vrot.slane %v980_v8, 4 }
 0x936   :  { %v982_v16 = vadd.f32 %v981_v61, %v980_v8 }
 0x938   :  { %v983_v19 = vrot.slane %v982_v16, 2 }
 0x93a   :  { %v984_v23 = vadd.f32 %v983_v19, %v982_v16 }
 0x93c   :  { %v985_v24 = vrot.slane %v984_v23, 1 }
 0x93e   :  { %v986_v25 = vadd.f32 %v985_v24, %v984_v23  ;;  %v1209_v24 = vrot.slane %v2186_v3, %v1908_v42  ;;  %v297_v42 = vmul.f32 %v1923_v52, %v1912_v45 }
 0x940   :  { %v987_v63 = vmul.f32 0.125, %v986_v25 }
 0x942   :  { %v993_v26 = vadd.f32 1e-05, %v987_v63 }
 0x944   :  { %1724 = vrsqrt.f32 %v993_v26 }
 0x945   :  { %1726 = vlog2.f32 %v993_v26 }
 0x951   :  { %v1725_v32 = vpop.eup %1724 }
 0x952   :  { %v1727_v33 = vpop.eup %1726  ;;  %v995_v35 = vmul.f32 %v1725_v32, %v992_v30  ;;  %v298_v32 = vsel %vm47_vm1, %v297_v42, 0.0 }
 0x953   :  { %v1002_v37 = vmul.f32 0.6931472, %v1727_v33  ;;  %v965_v33 = vmul.f32 %v2174_v56, %v2163_v47 }
 0x954   :  { %v2192_v38 = vadd.f32 %v999_v31, %v995_v35 }
 0x955   :  { %v1003_v39 = vmul.f32 0.5, %v1002_v37 }
 0x956   :  { %v2195_v40 = vmul.f32 %v1044_v36, %v2192_v38 }
 0x957   :  { %v1004_v28 = vsub.f32 %v2068_v53, %v1003_v39  ;;  %v1421_v53 = vld [vmem:[%s2313_s1 + $0x1c8] sm:$0xff]  ;;  %s1689_s1 = spop %1688 }
 0x958   :  { %1648 = vmatmul.mubr.msk.f32.vlgmr.msra.gmra.mxu1 %vm47_vm1, %v2195_v40  ;;  %1655 = vmatpush3.msra.mxu0 %v1421_v53 }
 0x959   :  { %v1006_v41 = vrot.slane %v1004_v28, 5  ;;  %1685 = vmatprep.mubr.msk.f32.mxu1 %vm1763_vm0, %v1762_v2  ;;  %1656 = vmatprep.subr.mxu0 %v1762_v2 }
 0x95a   :  { %1657 = vmatpush3.msra.mxu0 %v1420_v29  ;;  %1670 = vmatpush3.msra.mxu1 %v1431_v7 }
 0x95b   :  { %v1008_v43 = vsel %vm341_vm4, %v1006_v41, 0.0  ;;  %1658 = vmatprep.subr.mxu0 %v1762_v2  ;;  %1671 = vmatprep.subr.mxu1 %v1762_v2 }
 0x95c   :  { %1009 = vadd.xlane.f32.xlu0 %v1008_v43  ;;  %1659 = vmatpush3.msra.mxu0 %v1419_v49 }
 0x95d   :  { %1660 = vmatprep.subr.mxu0 %v1762_v2  ;;  %1672 = vmatpush3.msra.mxu1 %v1430_v9  ;;  %v1324_v9 = vrot.slane %v2186_v3, %v1934_v18 }
 0x95e   :  { %1661 = vmatpush3.msra.mxu0 %v1418_v50  ;;  %1673 = vmatprep.subr.mxu1 %v1762_v2 }
 0x95f   :  { %1662 = vmatprep.subr.mxu0 %v1762_v2  ;;  %1674 = vmatpush3.msra.mxu1 %v1429_v17 }
 0x960   :  { %1663 = vmatpush3.msra.mxu0 %v1417_v51  ;;  %1675 = vmatprep.subr.mxu1 %v1762_v2 }
 0x961   :  { %1664 = vmatprep.subr.mxu0 %v1762_v2  ;;  %1676 = vmatpush3.msra.mxu1 %v1428_v10 }
 0x962   :  { %1665 = vmatpush3.msra.mxu0 %v1416_v54  ;;  %1677 = vmatprep.subr.mxu1 %v1762_v2 }
 0x963   :  { %1678 = vmatpush3.msra.mxu1 %v1427_v6 }
 0x964   :  { %1679 = vmatprep.subr.mxu1 %v1762_v2 }
 0x965   :  { %1680 = vmatpush3.msra.mxu1 %v1426_v11 }
 0x966   :  { %1681 = vmatprep.subr.mxu1 %v1762_v2 }
 0x967   :  { %1682 = vmatpush3.msra.mxu1 %v1425_v12 }
 0x968   :  { %1683 = vmatprep.subr.mxu1 %v1762_v2 }
 0x969   :  { %1684 = vmatpush3.msra.mxu1 %v1424_v13 }
 0xa18   :  { %v1119_v57 = vpop.f32.mrf.mxu1 }
 0xa19   :  { %v1120_v58 = vadd.f32 %v1119_v57, %v1049_v55 }
 0xa1a   :  { %v1649_v59 = vpop.f32.mrf.mxu1 }
 0xa1b   :  { %1728 = vtanh.f32 %v1120_v58  ;;  %v1124_v60 = vmax.f32 %v1120_v58, 0.0 }
 0xa28   :  { %v1729_v62 = vpop.eup %1728 }
 0xa29   :  { %v1125_v0 = vsel %vm18_vm2, %v1729_v62, %v1124_v60 }
 0xa2a   :  { %1667 = vmatmul.mubr.msk.f32.vlgmr.msra.gmra.mxu0 %vm128_vm3, %v1125_v0  ;;  %v1010_v0 = vpop.xlane.xlu0 %1009 }
 0xa2b   :  { %v1011_v7 = vrot.slane %v1010_v0, 4 }
 0xa2d   :  { %v1012_v17 = vadd.f32 %v1011_v7, %v1010_v0 }
 0xa2f   :  { %v1013_v12 = vrot.slane %v1012_v17, 2 }
 0xaea   :  { %v1199_v15 = vpop.f32.mrf.mxu0 }
 0xaeb   :  { %v1200_v8 = vadd.f32 %v1199_v15, %v1129_v14 }
 0xaec   :  { %v1668_v61 = vpop.f32.mrf.mxu0 }
 0xaed   :  { %1730 = vtanh.f32 %v1200_v8  ;;  %v1204_v16 = vmax.f32 %v1200_v8, 0.0 }
 0xaee   :  { %1732 = vlog2.f32 %v2060_v48  ;;  %v966_v48 = vsel %vm47_vm1, %v965_v33, 0.0 }
 0xafa   :  { %v1731_v19 = vpop.eup %1730 }
 0xafb   :  { %v1205_v23 = vsel %vm18_vm2, %v1731_v19, %v1204_v16  ;;  %v1733_v34 = vpop.eup %1732 }
 0xafc   :  { %1686 = vmatmul.mubr.msk.f32.vlgmr.msra.gmra.mxu1 %vm128_vm3, %v1205_v23  ;;  %v669_v26 = vmul.f32 0.6931472, %v1733_v34  ;;  %v1014_v23 = vadd.f32 %v1013_v12, %v1012_v17 }
 0xafe   :  { %v670_v27 = vmul.f32 0.5, %v669_v26  ;;  %v1015_v18 = vrot.slane %v1014_v23, 1  ;;  %v632_v26 = vmul.f32 %v2053_v4, %v2039_v1 }
 0xb00   :  { %v671_v22 = vsub.f32 %v1944_v21, %v670_v27  ;;  %v1040_v21 = vsub.f32 1.0, %v2186_v3 }
 0xb02   :  { %v673_v30 = vrot.slane %v671_v22, 5  ;;  %v1291_v39 = vrot.slane %v1040_v21, %v1804_v5 }
 0xb04   :  { %v675_v31 = vsel %vm341_vm4, %v673_v30, 0.0  ;;  %v1016_v30 = vadd.f32 %v1015_v18, %v1014_v23 }
 0xbbc   :  { %v1279_v25 = vpop.f32.mrf.mxu1 }
 0xbbd   :  { %v2277_v2 = vadd.f32 %v1279_v25, %v1209_v24 }
 0xbbe   :  { %v1687_v63 = vpop.f32.mrf.mxu1 }
 0xbbf   :  { %1284 = vrot.lane.b32.xlu1 %v2277_v2, %s1764_s21  ;;  %v1293_v35 = vsub.f32 0.0, %v2277_v2  ;;  %v1298_v42 = vmul.f32 %v1291_v39, %v2277_v2 }
 0xbc1   :  { %v1294_v36 = vmul.f32 1.442695, %v1293_v35 }
 0xbc3   :  { %1734 = vpow2.f32 %v1294_v36 }
 0xbd0   :  { %v1735_v28 = vpop.eup %1734 }
 0xbe3   :  { %676 = vadd.xlane.f32.xlu1 %v675_v31  ;;  %v633_v31 = vsel %vm47_vm1, %v632_v26, 0.0 }
 0xbe7   :  { %299 = vadd.xlane.f32.xlu1 %v298_v32  ;;  %v1299_v32 = vsel %vm47_vm1, %v1298_v42, 0.0 }
 0xbeb   :  { %967 = vadd.xlane.f32.xlu1 %v966_v48 }
 0xc31   :  { %v1285_v37 = vpop.permute.xlu1 %1284 }
 0xc32   :  { %v1287_v45 = vsub.f32 %v2192_v38, %v1285_v37 }
 0xc34   :  { %v1292_v52 = vmul.f32 %v1291_v39, %v1287_v45 }
 0xc36   :  { %v1296_v41 = vmul.f32 %v1735_v28, %v1292_v52  ;;  %v352_v52 = vstv %s1689_s1 }
 0xc38   :  { %v1297_v47 = vadd.f32 %v1296_v41, %v2195_v40 }
 0xc3a   :  { %v1303_v56 = vsel %vm47_vm1, %v1297_v47, 0.0 }
 0xc3b   :  { %v1304_v43 = vrot.slane %v1303_v56, 4 }
 0xc3d   :  { %v1305_v44 = vadd.f32 %v1304_v43, %v1303_v56 }
 0xc3f   :  { %v1306_v46 = vrot.slane %v1305_v44, 2 }
 0xc41   :  { %v1307_v53 = vadd.f32 %v1306_v46, %v1305_v44 }
 0xc43   :  { %v1308_v29 = vrot.slane %v1307_v53, 1 }
 0xc45   :  { %v1309_v49 = vadd.f32 %v1308_v29, %v1307_v53  ;;  %v1332_v53 = vrot.slane %v2186_v3, %v1939_v20 }
 0xc47   :  { %v1310_v50 = vmul.f32 0.125, %v1309_v49 }
 0xc49   :  { %v1311_v51 = vsub.f32 %v1297_v47, %v1310_v50 }
 0xc4b   :  { %v1312_v54 = vmul.f32 %v1311_v51, %v1311_v51  ;;  %v1325_v6 = vmul.f32 %v1324_v9, %v1311_v51 }
 0xc4d   :  { %v1313_v5 = vsel %vm47_vm1, %v1312_v54, 0.0 }
 0xc4e   :  { %v1314_v55 = vrot.slane %v1313_v5, 4 }
 0xc50   :  { %v1315_v38 = vadd.f32 %v1314_v55, %v1313_v5 }
 0xc52   :  { %v1316_v57 = vrot.slane %v1315_v38, 2 }
 0xc54   :  { %v1317_v58 = vadd.f32 %v1316_v57, %v1315_v38 }
 0xc56   :  { %v1318_v59 = vrot.slane %v1317_v58, 1 }
 0xc58   :  { %v1319_v60 = vadd.f32 %v1318_v59, %v1317_v58 }
 0xc5a   :  { %v1320_v40 = vmul.f32 0.125, %v1319_v60 }
 0xc5c   :  { %v1326_v62 = vadd.f32 1e-05, %v1320_v40 }
 0xc5e   :  { %1736 = vlog2.f32 %v1326_v62 }
 0xc5f   :  { %1738 = vrsqrt.f32 %v1326_v62 }
 0xc6b   :  { %v1737_v10 = vpop.eup %1736 }
 0xc6c   :  { %v1739_v11 = vpop.eup %1738  ;;  %v677_v13 = vpop.xlane.xlu1 %676  ;;  %v1335_v14 = vmul.f32 0.6931472, %v1737_v10 }
 0xc6d   :  { %v678_v15 = vrot.slane %v677_v13, 4  ;;  %v1328_v8 = vmul.f32 %v1739_v11, %v1325_v6 }
 0xc6e   :  { %v1336_v61 = vmul.f32 0.5, %v1335_v14 }
 0xc6f   :  { %v679_v16 = vadd.f32 %v678_v15, %v677_v13  ;;  %v1333_v54 = vadd.f32 %v1332_v53, %v1328_v8 }
 0xc70   :  { %v1337_v19 = vsub.f32 %v2186_v3, %v1336_v61  ;;  %v300_v37 = vpop.xlane.xlu1 %299 }
 0xc71   :  { %v680_v24 = vrot.slane %v679_v16, 2  ;;  %v301_v45 = vsub.f32 0.0, %v300_v37 }
 0xc72   :  { %v1339_v25 = vrot.slane %v1337_v19, 5 }
 0xc73   :  { %v681_v63 = vadd.f32 %v680_v24, %v679_v16  ;;  %v353_v2 = vadd.f32 %v352_v52, %v301_v45 }
 0xc74   :  { %v1341_v34 = vsel %vm341_vm4, %v1339_v25, 0.0  ;;  %v968_v56 = vpop.xlane.xlu1 %967 }
 0xc75   :  { %1342 = vadd.xlane.f32.xlu0 %v1341_v34  ;;  %v682_v27 = vrot.slane %v681_v63, 1 }
 0xc77   :  { %v683_v22 = vadd.f32 %v682_v27, %v681_v63 }
 0xc79   :  { %1690 = vpush %v683_v22  ;;  %634 = vadd.xlane.f32.xlu0 %v633_v31 }
 0xc7a   :  { %1692 = vpush %v1016_v30 }
 0xc7d   :  { %1300 = vadd.xlane.f32.xlu0 %v1299_v32 }
 0xcaa   :  { %s1691_s21 = spop %1690 }
 0xcab   :  { %v685_v41 = vstv %s1691_s21  ;;  %s1693_s0 = spop %1692 }
 0xcac   :  { %v1018_v44 = vstv %s1693_s0 }
 0xcfe   :  { %v1343_v33 = vpop.xlane.xlu0 %1342 }
 0xcff   :  { %v1344_v48 = vrot.slane %v1343_v33, 4 }
 0xd01   :  { %v1345_v35 = vadd.f32 %v1344_v48, %v1343_v33 }
 0xd02   :  { %v635_v28 = vpop.xlane.xlu0 %634 }
 0xd03   :  { %v1346_v36 = vrot.slane %v1345_v35, 2  ;;  %v636_v39 = vsub.f32 %v353_v2, %v635_v28 }
 0xd05   :  { %v1347_v21 = vadd.f32 %v1346_v36, %v1345_v35  ;;  %v686_v47 = vadd.f32 %v685_v41, %v636_v39 }
 0xd06   :  { %v1301_v29 = vpop.xlane.xlu0 %1300 }
 0xd07   :  { %v1348_v1 = vrot.slane %v1347_v21, 1  ;;  %v969_v43 = vsub.f32 %v686_v47, %v968_v56 }
 0xd09   :  { %v1349_v4 = vadd.f32 %v1348_v1, %v1347_v21  ;;  %v1019_v46 = vadd.f32 %v1018_v44, %v969_v43 }
 0xd0b   :  { %1694 = vpush %v1349_v4  ;;  %v1302_v49 = vsub.f32 %v1019_v46, %v1301_v29 }
 0xd3c   :  { %s1695_s20 = spop %1694 }
 0xd3d   :  { %v1351_v50 = vstv %s1695_s20 }
 0xd3e   :  { %v1352_v51 = vadd.f32 %v1351_v50, %v1302_v49 }
 0xd40   :  { %v1353_v5 = vsel %vm47_vm1, %v1333_v54, %v1352_v51 }
 0xd41   :  { %1355 = vst.msk [vmem:[#allocation2] sm:$0xff] %vm1354_vm5, %v1353_v5 }
 0xd42   :  { %1751 = shalt.err (!%p1748_p4)
}
 0xd43   :  { %1365 = dma.vmem_to_hbm [thread:$0]  %s1363_s23, 128, %s2315_s3, [#allocation3]  }
 0xd44   :  { %1760 = dma.done.wait [#allocation3], 128  }
 0xd45   :  { %1761 = vsyncadd [#allocation3], 4294967168 }
 0xd46   :  { %1369 = vsyncpa [#allocation3], 1 }

</bundles_post_ra>
